<compile_context>
chip_gen: v6e
topology: v6e:2x2x1
jax: 0.10.0
libtpu: 0.0.40
codegen_flags: <defaults>
</compile_context>

<pallas_src>
import jax
import jax.numpy as jnp
from jax.experimental import pallas as pl
from jax.experimental.pallas import tpu as pltpu


def _round_up(n: int, m: int) -> int:
    return ((n + m - 1) // m) * m


def ffn_kernel(x_ref, w1_ref, b1_ref, w2_ref, b2_ref, o_ref, acc_ref):
    """Grid = (M tiles, F tiles).  Per step: accumulate one F-slice of
    relu(x @ W1 + b1) @ W2 into acc; on the last F step add b2 + residual."""
    f = pl.program_id(1)
    n_f = pl.num_programs(1)

    @pl.when(f == 0)
    def _init():
        acc_ref[...] = jnp.zeros_like(acc_ref)

    x = x_ref[...]                                  # (tm, Cp), original dtype
    x_mx = x.astype(w1_ref.dtype)                   # bf16 for the MXU

    # Linear 1 (this F tile) + bias + ReLU; f32 accumulate, f32 elementwise.
    h = jnp.dot(x_mx, w1_ref[...], preferred_element_type=jnp.float32)
    h = jnp.maximum(h + b1_ref[...], 0.0)           # (tm, tf) f32
    # TODO(synk): eval-mode Dropout is identity; training-mode mask would go here.

    # Partial Linear 2 contribution of this F tile (bf16 in, f32 accumulate).
    acc_ref[...] += jnp.dot(h.astype(w2_ref.dtype), w2_ref[...],
                            preferred_element_type=jnp.float32)

    @pl.when(f == n_f - 1)
    def _finalize():
        y = acc_ref[...] + b2_ref[...] + x.astype(jnp.float32)   # residual
        o_ref[...] = y.astype(o_ref.dtype)


def ffn_pallas(x, w1, b1, w2, b2, *, tile_m=256, tile_f=512,
               compute_dtype=jnp.bfloat16):
    """x: (L, B, C).  w1: (C, F), b1: (F,), w2: (F, C), b2: (C,)."""
    L, B, C = x.shape
    F = w1.shape[1]
    M = L * B

    # Lane-dense padding (last dims -> multiples of 128) + M tile padding.
    C_pad = _round_up(C, 128)
    tile_f = min(tile_f, _round_up(F, 128))
    F_pad = _round_up(F, tile_f)
    tile_m = min(tile_m, _round_up(M, 128))
    M_pad = _round_up(M, tile_m)
    assert tile_m % 8 == 0 and tile_f % 128 == 0

    n_m = M_pad // tile_m
    n_f = F_pad // tile_f

    xp = jnp.pad(x.reshape(M, C), ((0, M_pad - M), (0, C_pad - C)))
    w1p = jnp.pad(w1.astype(compute_dtype), ((0, C_pad - C), (0, F_pad - F)))
    b1p = jnp.pad(b1.astype(jnp.float32), (0, F_pad - F)).reshape(1, F_pad)
    w2p = jnp.pad(w2.astype(compute_dtype), ((0, F_pad - F), (0, C_pad - C)))
    b2p = jnp.pad(b2.astype(jnp.float32), (0, C_pad - C)).reshape(1, C_pad)

    # Advisory cost for the surrounding XLA schedule.
    flops = 4 * M_pad * C_pad * F_pad                   # two matmuls, 2 flops/MAC
    bytes_accessed = sum(int(a.size) * a.dtype.itemsize
                         for a in (xp, w1p, b1p, w2p, b2p))
    bytes_accessed += M_pad * C_pad * x.dtype.itemsize  # output
    cost = pl.CostEstimate(flops=flops, transcendentals=0,
                           bytes_accessed=bytes_accessed)

    # Rough VMEM footprint; only raise the scoped limit when it matters.
    cdt = jnp.dtype(compute_dtype).itemsize
    w_bufs = 1 if n_f == 1 else 2
    vmem_est = (2 * tile_m * C_pad * xp.dtype.itemsize        # x (dbl buffered)
                + 2 * tile_m * C_pad * x.dtype.itemsize       # out
                + w_bufs * 2 * C_pad * tile_f * cdt           # W1 + W2 tiles
                + 2 * (tile_f + C_pad) * 4                    # biases
                + tile_m * C_pad * 4                          # f32 accumulator
                + tile_m * tile_f * 4)                        # h headroom
    vmem_limit = None
    if vmem_est > (24 << 20):
        vmem_limit = int(min(max(2 * vmem_est, 32 << 20), 64 << 20))

    def run(single_buffer_constants: bool):
        def const_mode(is_const):
            # Grid-invariant blocks don't need double buffering.
            if single_buffer_constants and is_const:
                return pl.Buffered(1)
            return None

        in_specs = [
            pl.BlockSpec((tile_m, C_pad), lambda i, f: (i, 0)),
            pl.BlockSpec((C_pad, tile_f), lambda i, f: (0, f),
                         pipeline_mode=const_mode(n_f == 1)),
            pl.BlockSpec((1, tile_f), lambda i, f: (0, f),
                         pipeline_mode=const_mode(n_f == 1)),
            pl.BlockSpec((tile_f, C_pad), lambda i, f: (f, 0),
                         pipeline_mode=const_mode(n_f == 1)),
            pl.BlockSpec((1, C_pad), lambda i, f: (0, 0),
                         pipeline_mode=const_mode(True)),
        ]
        out_specs = pl.BlockSpec((tile_m, C_pad), lambda i, f: (i, 0))

        return pl.pallas_call(
            ffn_kernel,
            out_shape=jax.ShapeDtypeStruct((M_pad, C_pad), x.dtype),
            grid_spec=pltpu.PrefetchScalarGridSpec(
                num_scalar_prefetch=0,
                grid=(n_m, n_f),
                in_specs=in_specs,
                out_specs=out_specs,
                scratch_shapes=[pltpu.VMEM((tile_m, C_pad), jnp.float32)],
            ),
            compiler_params=pltpu.CompilerParams(
                dimension_semantics=("parallel", "arbitrary"),
                vmem_limit_bytes=vmem_limit),
            cost_estimate=cost,
        )(xp, w1p, b1p, w2p, b2p)

    try:
        outp = run(single_buffer_constants=True)
    except Exception:
        # pl.Buffered(1) hint unsupported on this jax version: same kernel,
        # default (double) buffering.
        outp = run(single_buffer_constants=False)

    return outp[:M, :C].reshape(L, B, C)


def ffn_reference(x, w1, b1, w2, b2):
    h = jnp.maximum(x @ w1 + b1, 0.0)
    return h @ w2 + b2 + x


if __name__ == "__main__":
    # Small shapes consistent with FFN(embed_dims, feedforward_dims, dropout).
    # Chosen so the demo exercises BOTH grid axes: 2 M tiles and 2 F tiles.
    embed_dims = 32
    feedforward_dims = 256
    seq_len, batch = 96, 2

    key = jax.random.PRNGKey(0)
    kx, k1, k2, k3, k4 = jax.random.split(key, 5)

    x = jax.random.normal(kx, (seq_len, batch, embed_dims), dtype=jnp.float32)
    # Linear weights stored transposed: (in, out).
    w1 = jax.random.normal(k1, (embed_dims, feedforward_dims), jnp.float32) * 0.05
    b1 = jax.random.normal(k2, (feedforward_dims,), jnp.float32) * 0.01
    w2 = jax.random.normal(k3, (feedforward_dims, embed_dims), jnp.float32) * 0.05
    b2 = jax.random.normal(k4, (embed_dims,), jnp.float32) * 0.01

    out = ffn_pallas(x, w1, b1, w2, b2, tile_m=128, tile_f=128)
    out = jax.block_until_ready(out)

    ref = ffn_reference(x, w1, b1, w2, b2)
    assert out.shape == x.shape and out.dtype == x.dtype
    # bf16 MXU inputs vs f32 reference: tolerance documented (expected err ~1e-3).
    max_err = float(jnp.max(jnp.abs(out - ref)))
    assert jnp.allclose(out, ref, atol=3e-2, rtol=3e-2), (
        f"mismatch vs reference (max abs err {max_err})")

    print("KERNEL_OK")
</pallas_src>

<mosaic_0001>
module attributes {stable_mosaic.version = 11 : i64} {
  func.func @ffn_kernel(%arg0: i32, %arg1: i32, %arg2: memref<128x128xf32, #tpu.memory_space<vmem>>, %arg3: memref<128x128xbf16, #tpu.memory_space<vmem>>, %arg4: memref<1x128xf32, #tpu.memory_space<vmem>>, %arg5: memref<128x128xbf16, #tpu.memory_space<vmem>>, %arg6: memref<1x128xf32, #tpu.memory_space<vmem>>, %arg7: memref<128x128xf32, #tpu.memory_space<vmem>>, %arg8: memref<128x128xf32, #tpu.memory_space<vmem>>) attributes {dimension_semantics = [#tpu.dimension_semantics<parallel>, #tpu.dimension_semantics<arbitrary>], iteration_bounds = array<i64: 2, 2>, scalar_prefetch = 0 : i64, scratch_operands = 1 : i64, tpu.core_type = #tpu.core_type<tc>, window_params = [{transform_indices = @transform_0, window_bounds = array<i64: 128, 128>}, {transform_indices = @transform_1, window_bounds = array<i64: 128, 128>}, {transform_indices = @transform_2, window_bounds = array<i64: 1, 128>}, {transform_indices = @transform_3, window_bounds = array<i64: 128, 128>}, {pipeline_mode = #tpu.pipeline_mode<synchronous>, transform_indices = @transform_4, window_bounds = array<i64: 1, 128>}, {transform_indices = @transform_5, window_bounds = array<i64: 128, 128>}]} {
    %c0_i32 = arith.constant 0 : i32
    %0 = arith.cmpi eq, %arg1, %c0_i32 : i32
    %1 = arith.extui %0 : i1 to i32
    %c0_i32_0 = arith.constant 0 : i32
    %2 = arith.cmpi ne, %1, %c0_i32_0 : i32
    scf.if %2 {
      %cst_15 = arith.constant 0.000000e+00 : f32
      %21 = vector.broadcast %cst_15 : f32 to vector<128x128xf32>
      %c0_16 = arith.constant 0 : index
      %c0_17 = arith.constant 0 : index
      %22 = vector.load %arg8[%c0_16, %c0_17] : memref<128x128xf32, #tpu.memory_space<vmem>>, vector<128x128xf32>
      tpu.vector_store %arg8[%c0_16, %c0_17], %21 {strides = array<i32>} : memref<128x128xf32, #tpu.memory_space<vmem>>, vector<128x128xf32>,
    } else {
    }
    %c0 = arith.constant 0 : index
    %c0_1 = arith.constant 0 : index
    %3 = vector.load %arg2[%c0, %c0_1] : memref<128x128xf32, #tpu.memory_space<vmem>>, vector<128x128xf32>
    %4 = arith.truncf %3 : vector<128x128xf32> to vector<128x128xbf16>
    %c0_2 = arith.constant 0 : index
    %c0_3 = arith.constant 0 : index
    %5 = vector.load %arg3[%c0_2, %c0_3] : memref<128x128xbf16, #tpu.memory_space<vmem>>, vector<128x128xbf16>
    %cst = arith.constant dense<0.000000e+00> : vector<128x128xf32>
    %6 = tpu.matmul %4, %5, %cst {dimension_numbers = #tpu.dot_dimension_numbers<[1], [0], [0], [1], [0, 0, 1, 1], [], []>} : vector<128x128xbf16>, vector<128x128xbf16>, vector<128x128xf32> -> vector<128x128xf32>
    %c0_4 = arith.constant 0 : index
    %c0_5 = arith.constant 0 : index
    %7 = vector.load %arg4[%c0_4, %c0_5] : memref<1x128xf32, #tpu.memory_space<vmem>>, vector<1x128xf32>
    %8 = vector.broadcast %7 : vector<1x128xf32> to vector<128x128xf32>
    %9 = arith.addf %6, %8 : vector<128x128xf32>
    %cst_6 = arith.constant 0.000000e+00 : f32
    %10 = vector.broadcast %cst_6 : f32 to vector<128x128xf32>
    %11 = arith.maximumf %9, %10 : vector<128x128xf32>
    %c0_7 = arith.constant 0 : index
    %c0_8 = arith.constant 0 : index
    %12 = vector.load %arg8[%c0_7, %c0_8] : memref<128x128xf32, #tpu.memory_space<vmem>>, vector<128x128xf32>
    %13 = arith.truncf %11 : vector<128x128xf32> to vector<128x128xbf16>
    %c0_9 = arith.constant 0 : index
    %c0_10 = arith.constant 0 : index
    %14 = vector.load %arg5[%c0_9, %c0_10] : memref<128x128xbf16, #tpu.memory_space<vmem>>, vector<128x128xbf16>
    %cst_11 = arith.constant dense<0.000000e+00> : vector<128x128xf32>
    %15 = tpu.matmul %13, %14, %cst_11 {dimension_numbers = #tpu.dot_dimension_numbers<[1], [0], [0], [1], [0, 0, 1, 1], [], []>} : vector<128x128xbf16>, vector<128x128xbf16>, vector<128x128xf32> -> vector<128x128xf32>
    %16 = arith.addf %12, %15 : vector<128x128xf32>
    %c0_12 = arith.constant 0 : index
    %c0_13 = arith.constant 0 : index
    %17 = vector.load %arg8[%c0_12, %c0_13] : memref<128x128xf32, #tpu.memory_space<vmem>>, vector<128x128xf32>
    tpu.vector_store %arg8[%c0_12, %c0_13], %16 {strides = array<i32>} : memref<128x128xf32, #tpu.memory_space<vmem>>, vector<128x128xf32>,
    %c1_i32 = arith.constant 1 : i32
    %18 = arith.cmpi eq, %arg1, %c1_i32 : i32
    %19 = arith.extui %18 : i1 to i32
    %c0_i32_14 = arith.constant 0 : i32
    %20 = arith.cmpi ne, %19, %c0_i32_14 : i32
    scf.if %20 {
      %c0_15 = arith.constant 0 : index
      %c0_16 = arith.constant 0 : index
      %21 = vector.load %arg8[%c0_15, %c0_16] : memref<128x128xf32, #tpu.memory_space<vmem>>, vector<128x128xf32>
      %c0_17 = arith.constant 0 : index
      %c0_18 = arith.constant 0 : index
      %22 = vector.load %arg6[%c0_17, %c0_18] : memref<1x128xf32, #tpu.memory_space<vmem>>, vector<1x128xf32>
      %23 = vector.broadcast %22 : vector<1x128xf32> to vector<128x128xf32>
      %24 = arith.addf %21, %23 : vector<128x128xf32>
      %25 = arith.addf %24, %3 : vector<128x128xf32>
      %c0_19 = arith.constant 0 : index
      %c0_20 = arith.constant 0 : index
      %26 = vector.load %arg7[%c0_19, %c0_20] : memref<128x128xf32, #tpu.memory_space<vmem>>, vector<128x128xf32>
      tpu.vector_store %arg7[%c0_19, %c0_20], %25 {strides = array<i32>} : memref<128x128xf32, #tpu.memory_space<vmem>>, vector<128x128xf32>,
    } else {
    }
    return
  }
  func.func @transform_0(%arg0: i32, %arg1: i32) -> (i32, i32) {
    %c0_i32 = arith.constant 0 : i32
    %c0_i32_0 = arith.constant 0 : i32
    return %arg0, %c0_i32 : i32, i32
  }
  func.func @transform_1(%arg0: i32, %arg1: i32) -> (i32, i32) {
    %c0_i32 = arith.constant 0 : i32
    %c0_i32_0 = arith.constant 0 : i32
    return %c0_i32, %arg1 : i32, i32
  }
  func.func @transform_2(%arg0: i32, %arg1: i32) -> (i32, i32) {
    %c0_i32 = arith.constant 0 : i32
    %c0_i32_0 = arith.constant 0 : i32
    return %c0_i32, %arg1 : i32, i32
  }
  func.func @transform_3(%arg0: i32, %arg1: i32) -> (i32, i32) {
    %c0_i32 = arith.constant 0 : i32
    %c0_i32_0 = arith.constant 0 : i32
    return %arg1, %c0_i32 : i32, i32
  }
  func.func @transform_4(%arg0: i32, %arg1: i32) -> (i32, i32) {
    %c0_i32 = arith.constant 0 : i32
    %c0_i32_0 = arith.constant 0 : i32
    %c0_i32_1 = arith.constant 0 : i32
    return %c0_i32, %c0_i32_0 : i32, i32
  }
  func.func @transform_5(%arg0: i32, %arg1: i32) -> (i32, i32) {
    %c0_i32 = arith.constant 0 : i32
    %c0_i32_0 = arith.constant 0 : i32
    return %arg0, %c0_i32 : i32, i32
  }
}

module attributes {stable_mosaic.version = 11 : i64} {
  func.func @ffn_kernel(%arg0: i32, %arg1: i32, %arg2: memref<128x128xf32, #tpu.memory_space<vmem>>, %arg3: memref<128x128xbf16, #tpu.memory_space<vmem>>, %arg4: memref<1x128xf32, #tpu.memory_space<vmem>>, %arg5: memref<128x128xbf16, #tpu.memory_space<vmem>>, %arg6: memref<1x128xf32, #tpu.memory_space<vmem>>, %arg7: memref<128x128xf32, #tpu.memory_space<vmem>>, %arg8: memref<128x128xf32, #tpu.memory_space<vmem>>) attributes {dimension_semantics = [#tpu.dimension_semantics<parallel>, #tpu.dimension_semantics<arbitrary>], iteration_bounds = array<i64: 2, 2>, scalar_prefetch = 0 : i64, scratch_operands = 1 : i64, tpu.core_type = #tpu.core_type<tc>, window_params = [{transform_indices = @transform_0, window_bounds = array<i64: 128, 128>}, {transform_indices = @transform_1, window_bounds = array<i64: 128, 128>}, {transform_indices = @transform_2, window_bounds = array<i64: 1, 128>}, {transform_indices = @transform_3, window_bounds = array<i64: 128, 128>}, {pipeline_mode = #tpu.pipeline_mode<synchronous>, transform_indices = @transform_4, window_bounds = array<i64: 1, 128>}, {transform_indices = @transform_5, window_bounds = array<i64: 128, 128>}]} {
    %c0_i32 = arith.constant 0 : i32
    %0 = arith.cmpi eq, %arg1, %c0_i32 : i32
    %1 = arith.extui %0 : i1 to i32
    %c0_i32_0 = arith.constant 0 : i32
    %2 = arith.cmpi ne, %1, %c0_i32_0 : i32
    scf.if %2 {
      %cst_15 = arith.constant 0.000000e+00 : f32
      %21 = vector.broadcast %cst_15 : f32 to vector<128x128xf32>
      %c0_16 = arith.constant 0 : index
      %c0_17 = arith.constant 0 : index
      %22 = vector.load %arg8[%c0_16, %c0_17] : memref<128x128xf32, #tpu.memory_space<vmem>>, vector<128x128xf32>
      tpu.vector_store %arg8[%c0_16, %c0_17], %21 {strides = array<i32>} : memref<128x128xf32, #tpu.memory_space<vmem>>, vector<128x128xf32>,
    } else {
    }
    %c0 = arith.constant 0 : index
    %c0_1 = arith.constant 0 : index
    %3 = vector.load %arg2[%c0, %c0_1] : memref<128x128xf32, #tpu.memory_space<vmem>>, vector<128x128xf32>
    %4 = arith.truncf %3 : vector<128x128xf32> to vector<128x128xbf16>
    %c0_2 = arith.constant 0 : index
    %c0_3 = arith.constant 0 : index
    %5 = vector.load %arg3[%c0_2, %c0_3] : memref<128x128xbf16, #tpu.memory_space<vmem>>, vector<128x128xbf16>
    %cst = arith.constant dense<0.000000e+00> : vector<128x128xf32>
    %6 = tpu.matmul %4, %5, %cst {dimension_numbers = #tpu.dot_dimension_numbers<[1], [0], [0], [1], [0, 0, 1, 1], [], []>} : vector<128x128xbf16>, vector<128x128xbf16>, vector<128x128xf32> -> vector<128x128xf32>
    %c0_4 = arith.constant 0 : index
    %c0_5 = arith.constant 0 : index
    %7 = vector.load %arg4[%c0_4, %c0_5] : memref<1x128xf32, #tpu.memory_space<vmem>>, vector<1x128xf32>
    %8 = vector.broadcast %7 : vector<1x128xf32> to vector<128x128xf32>
    %9 = arith.addf %6, %8 : vector<128x128xf32>
    %cst_6 = arith.constant 0.000000e+00 : f32
    %10 = vector.broadcast %cst_6 : f32 to vector<128x128xf32>
    %11 = arith.maximumf %9, %10 : vector<128x128xf32>
    %c0_7 = arith.constant 0 : index
    %c0_8 = arith.constant 0 : index
    %12 = vector.load %arg8[%c0_7, %c0_8] : memref<128x128xf32, #tpu.memory_space<vmem>>, vector<128x128xf32>
    %13 = arith.truncf %11 : vector<128x128xf32> to vector<128x128xbf16>
    %c0_9 = arith.constant 0 : index
    %c0_10 = arith.constant 0 : index
    %14 = vector.load %arg5[%c0_9, %c0_10] : memref<128x128xbf16, #tpu.memory_space<vmem>>, vector<128x128xbf16>
    %cst_11 = arith.constant dense<0.000000e+00> : vector<128x128xf32>
    %15 = tpu.matmul %13, %14, %cst_11 {dimension_numbers = #tpu.dot_dimension_numbers<[1], [0], [0], [1], [0, 0, 1, 1], [], []>} : vector<128x128xbf16>, vector<128x128xbf16>, vector<128x128xf32> -> vector<128x128xf32>
    %16 = arith.addf %12, %15 : vector<128x128xf32>
    %c0_12 = arith.constant 0 : index
    %c0_13 = arith.constant 0 : index
    %17 = vector.load %arg8[%c0_12, %c0_13] : memref<128x128xf32, #tpu.memory_space<vmem>>, vector<128x128xf32>
    tpu.vector_store %arg8[%c0_12, %c0_13], %16 {strides = array<i32>} : memref<128x128xf32, #tpu.memory_space<vmem>>, vector<128x128xf32>,
    %c1_i32 = arith.constant 1 : i32
    %18 = arith.cmpi eq, %arg1, %c1_i32 : i32
    %19 = arith.extui %18 : i1 to i32
    %c0_i32_14 = arith.constant 0 : i32
    %20 = arith.cmpi ne, %19, %c0_i32_14 : i32
    scf.if %20 {
      %c0_15 = arith.constant 0 : index
      %c0_16 = arith.constant 0 : index
      %21 = vector.load %arg8[%c0_15, %c0_16] : memref<128x128xf32, #tpu.memory_space<vmem>>, vector<128x128xf32>
      %c0_17 = arith.constant 0 : index
      %c0_18 = arith.constant 0 : index
      %22 = vector.load %arg6[%c0_17, %c0_18] : memref<1x128xf32, #tpu.memory_space<vmem>>, vector<1x128xf32>
      %23 = vector.broadcast %22 : vector<1x128xf32> to vector<128x128xf32>
      %24 = arith.addf %21, %23 : vector<128x128xf32>
      %25 = arith.addf %24, %3 : vector<128x128xf32>
      %c0_19 = arith.constant 0 : index
      %c0_20 = arith.constant 0 : index
      %26 = vector.load %arg7[%c0_19, %c0_20] : memref<128x128xf32, #tpu.memory_space<vmem>>, vector<128x128xf32>
      tpu.vector_store %arg7[%c0_19, %c0_20], %25 {strides = array<i32>} : memref<128x128xf32, #tpu.memory_space<vmem>>, vector<128x128xf32>,
    } else {
    }
    return
  }
  func.func @transform_0(%arg0: i32, %arg1: i32) -> (i32, i32) {
    %c0_i32 = arith.constant 0 : i32
    %c0_i32_0 = arith.constant 0 : i32
    return %arg0, %c0_i32 : i32, i32
  }
  func.func @transform_1(%arg0: i32, %arg1: i32) -> (i32, i32) {
    %c0_i32 = arith.constant 0 : i32
    %c0_i32_0 = arith.constant 0 : i32
    return %c0_i32, %arg1 : i32, i32
  }
  func.func @transform_2(%arg0: i32, %arg1: i32) -> (i32, i32) {
    %c0_i32 = arith.constant 0 : i32
    %c0_i32_0 = arith.constant 0 : i32
    return %c0_i32, %arg1 : i32, i32
  }
  func.func @transform_3(%arg0: i32, %arg1: i32) -> (i32, i32) {
    %c0_i32 = arith.constant 0 : i32
    %c0_i32_0 = arith.constant 0 : i32
    return %arg1, %c0_i32 : i32, i32
  }
  func.func @transform_4(%arg0: i32, %arg1: i32) -> (i32, i32) {
    %c0_i32 = arith.constant 0 : i32
    %c0_i32_0 = arith.constant 0 : i32
    %c0_i32_1 = arith.constant 0 : i32
    return %c0_i32, %c0_i32_0 : i32, i32
  }
  func.func @transform_5(%arg0: i32, %arg1: i32) -> (i32, i32) {
    %c0_i32 = arith.constant 0 : i32
    %c0_i32_0 = arith.constant 0 : i32
    return %arg0, %c0_i32 : i32, i32
  }
}

</mosaic_0001>

<bundles_post_ra>
// kernel: tpu_custom_call.1
= control target key start
LH: loop header
LB: loop body
LE: loop exit
PB: predicated region body
PF: predicated region fallthrough
CT: control target
= control target key end

     0   :  { %s1976_s0 = inlined_call_operand.hbm [shape: f32[256,128], index: 0, kind: input, shape index: {}]   ;;  %s1977_s1 = inlined_call_operand.hbm [shape: bf16[128,256], index: 1, kind: input, shape index: {}]   ;;  %s1978_s2 = inlined_call_operand.vmem [shape: f32[1,256], index: 2, kind: input, shape index: {}]   ;;  %s1979_s3 = inlined_call_operand.hbm [shape: bf16[256,128], index: 3, kind: input, shape index: {}]   ;;  %s1980_s4 = inlined_call_operand.vmem [shape: f32[1,128], index: 4, kind: input, shape index: {}]   ;;  %s1981_s5 = inlined_call_operand.hbm [shape: f32[256,128], index: 5, kind: output, shape index: {}]  }
   0x1   :  { %1995 = sst [smem:[#allocation22_spill]] %s1976_s0 }
   0x2   :  { %1996 = sst [smem:[#allocation23_spill]] %s1977_s1 }
   0x3   :  { %1997 = sst [smem:[#allocation24_spill]] %s1980_s4 }
   0x4   :  { %1998 = sst [smem:[#allocation25_spill]] %s1981_s5 }
   0x5   :  { %10 = vsyncpa [#allocation4], 0 }
   0x6   :  { %12 = vsyncpa [#allocation4 + $0x1], 0 }
   0x7   :  { %13 = vsyncpa [#allocation7], 0 }
   0x8   :  { %15 = vsyncpa [#allocation7 + $0x1], 0 }
   0x9   :  { %16 = vsyncpa [#allocation5], 0 }
   0xa   :  { %18 = vsyncpa [#allocation5 + $0x1], 0  ;;  %s1546_s18 = smov 0   ;;  %s1548_s19 = smov 0  }
   0xb   :  { %s1550_s20 = smov 0   ;;  %s1552_s21 = smov 0  }
   0xc   :  { %s1554_s22 = smov 0   ;;  %s1556_s23 = smov 0  }
   0xd   :  { %s1558_s24 = smov 0   ;;  %s1560_s25 = smov 0  }
   0xe   :  { %s1562_s26 = smov 0   ;;  %s1564_s27 = smov 0  }
   0xf   :  { %s1566_s28 = smov 0  }
  0x10 LB: > { %1999 = sst [smem:[#allocation13_spill]] %s1471_s20  ;;  %s33_s29 = sadd.s32 1, %s1495_s26  ;;  %s1503_s28 = sphi %s1566_s28, %s24_s28   ;;  %s1499_s27 = sphi %s1564_s27, %s2036_s27   ;;  %s1495_s26 = sphi %s1562_s26, %s2042_s26   ;;  %s1491_s25 = sphi %s1560_s25, %s2034_s25   ;;  %s1487_s24 = sphi %s1558_s24, %s2041_s24   ;;  %s1483_s23 = sphi %s1556_s23, %s2033_s23   ;;  %s1479_s22 = sphi %s1554_s22, %s2040_s22   ;;  %s1475_s21 = sphi %s1552_s21, %s2039_s21   ;;  %s1471_s20 = sphi %s1550_s20, %s2031_s20   ;;  %s1467_s19 = sphi %s1548_s19, %s2038_s19   ;;  %s1463_s18 = sphi %s1546_s18, %s2037_s18  }
  0x11   : > { %2000 = sst [smem:[#allocation14_spill]] %s1483_s23  ;;  %p51_p0 = scmp.eq.s32.totalorder %s1503_s28, 0 }
  0x12   : > { %2001 = sst [smem:[#allocation15_spill]] %s1491_s25  ;;  %p1603_p1 = scmp.ge.s32.totalorder %s33_s29, 2 }
  0x13   : > { %2002 = sst [smem:[#allocation16_spill]] %s1499_s27  ;;  %s69_s6 = sadd.s32 1, %s1471_s20 }
  0x14   : > { %p76_p2 = scmp.ne.s32.totalorder %s1471_s20, %s1467_s19  ;;  %p82_p3 = scmp.ne.s32.totalorder %s1467_s19, %s1463_s18 }
  0x15   : > { %s2044_s29 = smov (%p1603_p1, %s33_s29), 0  ;;  %p1987_p5 = scmp.lt.s32.totalorder %s1503_s28, 4 }
  0x16   : > { %2004 = sst [smem:[#allocation17_spill]] %s2044_s29  ;;  %p1618_p4 = por %p76_p2, %p51_p0 }
  0x17   : > { %s66_s8 = ssub.s32 %s1495_s26, %s2044_s29  ;;  %s229_s9 = sand.u32 1, %s1503_s28  }
  0x18   : > { %p67_p6 = scmp.eq.s32.totalorder %s66_s8, 0  ;;  %s231_s10 = sand.u32 1, %s1471_s20  }
  0x19   : > { %s1630_s12 = sshll.u32 %s231_s10, 6  ;;  %s1027_s13 = sshll.u32 %s1495_s26, 6 }
  0x1a   : > { %s1628_s11 = scalar_select %p67_p6, %s1471_s20, %s69_s6  }
  0x1b   : > { %s2007_s1 = sld [smem:[#allocation23_spill]]  ;;  %s233_s17 = scalar_lea.vmem [#allocation6], %s1630_s12 }
  0x1c   : > { %2006 = sst [smem:[#allocation18_spill]] %s1628_s11  ;;  %s239_s5 = sshll.u32 %s233_s17, 4  ;;  %s240_s5 = int_to_ptr.vmem [resolvable:$true] %s239_s5 }
  0x1d   : > { %p1641_p7 = pnand %p1987_p5, %p1618_p4  ;;  %p1031_p8 = scmp.ge.s32.totalorder %s1503_s28, 1 }
  0x1e   : > { %s1646_s6 = scalar_lea.sflag [#allocation7], %s229_s9  ;;  %s1308_s8 = scalar_lea.vmem %s240_s5, 1024 }
  0x1f   : > { %p1986_p9 = pneg %p1641_p7  ;;  %p1309_p10 = scmp.ne.s32.totalorder %s240_s5, %s1308_s8 }
  0x20   : > { %s1505_s10 = smov [#allocation6]  }
  0x21   : > { %s238_s16 = scalar_lea.hbm %s2007_s1, %s1027_s13  ;;  %p1311_p11 = pnand %p1309_p10, %p1986_p9 }
  0x22   : > { %s1313_s7 = sshll.u32 %s1505_s10, 4  ;;  %s1314_s7 = int_to_ptr.vmem [resolvable:$false] %s1313_s7 }
  0x23   : > { %p1312_p12 = pneg %p1311_p11  ;;  %s1315_s13 = scalar_lea.vmem %s1314_s7, 2048 }
  0x24   : > { %p1316_p13 = scmp.lt.s32.totalorder %s240_s5, %s1314_s7  ;;  %p1317_p2 = scmp.lt.s32.totalorder %s1315_s13, %s1308_s8 }
  0x26   : > { %p1318_p4 = por %p1317_p2, %p1316_p13 }
  0x28   : > { %p1319_p6 = pnand %p1318_p4, %p1312_p12 }
  0x2a   : > { %1322 = shalt.err (!%p1319_p6)
}
  0x2b   : > { %s1988_s14 = smov 128   ;;  %s1984_s9 = smov 64  }
  0x2c   : > { %s1985_s15 = smov 4   ;;  %p274_p10 = scmp.lt.s32.totalorder %s1503_s28, 5 }
  0x2d   : > { %1174 = dma.hbm_to_vmem [thread:$0]  (!%p1641_p7), %s238_s16, 1024, %s240_s5, %s1646_s6, %s1988_s14, %s1984_s9, %s1985_s15  }
  0x2e   : > { %p1662_p11 = pnand %p1031_p8, %p274_p10  ;;  %s1667_s8 = sadd.s32 4294967295, %s1503_s28  }
  0x2f   : > { %s1020_s10 = sadd.s32 4294967294, %s1503_s28   ;;  %s36_s7 = sadd.s32 1, %s1499_s27 }
  0x30   : > { %s43_s13 = sadd.s32 1, %s1483_s23  ;;  %s2046_s7 = smov (!%p1603_p1, %s36_s7), %s1499_s27 }
  0x31   : > { %p50_p12 = scmp.ne.s32.totalorder %s1483_s23, %s1479_s22  ;;  %p56_p13 = scmp.ne.s32.totalorder %s1479_s22, %s1475_s21 }
  0x32   : > { %p38_p8 = scmp.ge.s32.totalorder %s2046_s7, 2  ;;  %p57_p2 = scmp.eq.s32.totalorder %s1667_s8, 0 }
  0x33   : > { %p1682_p4 = por %p51_p0, %p50_p12  ;;  %p179_p6 = scmp.eq.s32.totalorder %s1667_s8, 3 }
  0x34   : > { %s2048_s7 = smov (%p38_p8, %s2046_s7), 0  ;;  %p1692_p1 = por %p57_p2, %p56_p13 }
  0x35   : > { %2011 = sst [smem:[#allocation19_spill]] %s2048_s7  ;;  %p1699_p10 = por %p82_p3, %p57_p2 }
  0x36   : > { %s40_s9 = ssub.s32 %s1499_s27, %s2048_s7  ;;  %p1705_p0 = por %p179_p6, %p50_p12 }
  0x37   : > { %p41_p9 = scmp.eq.s32.totalorder %s40_s9, 0  ;;  %p185_p5 = scmp.eq.s32.totalorder %s1020_s10, 3 }
  0x38   : > { %s2014_s15 = scalar_select %p1705_p0, 1, 0 }
  0x39   : > { %s208_s14 = sand.u32 1, %s1483_s23   ;;  %s1061_s1 = sshll.u32 %s1499_s27, 11 }
  0x3a   : > { %2015 = sst [smem:[#allocation20_spill]] %s2014_s15  ;;  %p1717_p8 = por %p185_p5, %p56_p13 }
  0x3b   : > { %s1712_s11 = scalar_select %p41_p9, %s1483_s23, %s43_s13  }
  0x3c   : > { %s2017_s20 = scalar_select %p1717_p8, 1, 0 }
  0x3d   : > { %2016 = sst [smem:[#allocation21_spill]] %s1712_s11  ;;  %s1023_s18 = sshll.u32 %s208_s14, 7 }
  0x3e   : > { %s2018_s0 = sld [smem:[#allocation22_spill]]  ;;  %p2019_p3 = scmp.lt.s32.totalorder %s1503_s28, 4 }
  0x3f   : > { %s212_s9 = scalar_lea.vmem [#allocation3], %s1023_s18  ;;  %s209_s13 = scalar_lea.sflag [#allocation4], %s208_s14 }
  0x40   : > { %p1728_p12 = pnand %p2019_p3, %p1682_p4  ;;  %s219_s10 = sshll.u32 %s212_s9, 4  ;;  %s220_s10 = int_to_ptr.vmem [resolvable:$true] %s219_s10 }
  0x41   : > { %s1336_s27 = scalar_lea.vmem %s220_s10, 2048  ;;  %s1509_s11 = smov [#allocation3]  }
  0x42   : > { %p1325_p5 = pneg %p1728_p12  ;;  %p1337_p9 = scmp.ne.s32.totalorder %s220_s10, %s1336_s27 }
  0x43   : > { %s1341_s4 = sshll.u32 %s1509_s11, 4  ;;  %s1342_s4 = int_to_ptr.vmem [resolvable:$false] %s1341_s4 }
  0x44   : > { %s218_s7 = scalar_lea.hbm %s2018_s0, %s1061_s1  ;;  %p1339_p13 = pnand %p1337_p9, %p1325_p5 }
  0x45   : > { %s1343_s1 = scalar_lea.vmem %s1342_s4, 4096  ;;  %p1344_p6 = scmp.lt.s32.totalorder %s220_s10, %s1342_s4 }
  0x46   : > { %p1340_p2 = pneg %p1339_p13  ;;  %p1345_p4 = scmp.lt.s32.totalorder %s1343_s1, %s1336_s27 }
  0x48   : > { %p1346_p3 = por %p1345_p4, %p1344_p6 }
  0x4a   : > { %p1347_p8 = pnand %p1346_p3, %p1340_p2 }
  0x4c   : > { %1350 = shalt.err (!%p1347_p8)
}
  0x4d   : > { %s1510_s25 = smov 8   ;;  %s2021_s5 = smov 128  }
  0x4e   : > { %1171 = dma.hbm_to_vmem [thread:$0]  (!%p1728_p12), %s218_s7, 2048, %s220_s10, %s209_s13, %s2021_s5, %s2021_s5, %s1510_s25  }
  0x4f   : > { %s1062_s14 = sshll.u32 %s1495_s26, 10  ;;  %s259_s0 = scalar_lea.vmem [#allocation8], %s1630_s12 }
  0x50   : > { %s265_s11 = scalar_lea.hbm %s1979_s3, %s1062_s14  ;;  %s266_s4 = sshll.u32 %s259_s0, 4  ;;  %s267_s4 = int_to_ptr.vmem [resolvable:$true] %s266_s4 }
  0x51   : > { %s1364_s27 = scalar_lea.vmem %s267_s4, 1024  ;;  %p2022_p8 = pneg %p1641_p7 }
  0x52   : > { %p1365_p5 = scmp.ne.s32.totalorder %s267_s4, %s1364_s27  ;;  %s1511_s15 = smov [#allocation8]  }
  0x53   : > { %s1369_s1 = sshll.u32 %s1511_s15, 4  ;;  %s1370_s1 = int_to_ptr.vmem [resolvable:$false] %s1369_s1 }
  0x54   : > { %p1367_p9 = pnand %p1365_p5, %p2022_p8  ;;  %s1371_s23 = scalar_lea.vmem %s1370_s1, 2048 }
  0x55   : > { %p1372_p2 = scmp.lt.s32.totalorder %s267_s4, %s1370_s1  ;;  %p1373_p12 = scmp.lt.s32.totalorder %s1371_s23, %s1364_s27 }
  0x56   : > { %p1368_p13 = pneg %p1367_p9 }
  0x57   : > { %p1374_p6 = por %p1373_p12, %p1372_p2 }
  0x59   : > { %p1375_p4 = pnand %p1374_p6, %p1368_p13 }
  0x5b   : > { %1378 = shalt.err (!%p1375_p4)
}
  0x5c   : > { %s2023_s12 = smov 4   ;;  %s2024_s0 = smov 64  }
  0x5d   : > { %1177 = dma.hbm_to_vmem [thread:$0]  (!%p1641_p7), %s265_s11, 1024, %s267_s4, %s1646_s6, %s2024_s0, %s2024_s0, %s2023_s12  }
  0x5e   : > { %278 = sbr.rel (%p1662_p11) target bundleno = 625 (0x271), region = 40  ;;  %s1755_s7 = sand.u32 (!%p1662_p11), 1, %s1479_s22  }
  0x5f   : > { %s1032_s23 = sshll.u32 (!%p1662_p11), %s1755_s7, 7  ;;  %s281_s10 = scalar_lea.sflag (!%p1662_p11), [#allocation4], %s1755_s7 }
  0x60   : > { %s1759_s13 = scalar_lea.vmem (!%p1662_p11), [#allocation3], %s1032_s23 }
  0x63   : > { %1450 = dma.done.wait (%p1692_p1), %s281_s10, 2048  }
  0x64   : > { %1452 = vsyncadd (%p1692_p1), %s281_s10, 4294965248  ;;  %s289_s29 = sand.u32 1, %s1667_s8   ;;  %s291_s6 = sand.u32 1, %s1467_s19  }
  0x65   : > { %s1033_s17 = sshll.u32 %s291_s6, 6  ;;  %s290_s25 = scalar_lea.sflag [#allocation7], %s289_s29 }
  0x66   : > { %s1767_s5 = scalar_lea.vmem [#allocation6], %s1033_s17 }
  0x67   : > { %1454 = dma.done.wait (%p1699_p10), %s290_s25, 2048  }
  0x68   : > { %1456 = vsyncadd (%p1699_p10), %s290_s25, 4294965248  ;;  %p343_p7 = scmp.lt.s32.totalorder %s1487_s24, 1  ;;  %s1781_s9 = scalar_lea.vmem [#allocation8], %s1033_s17 }
  0x69   : > { %s1783_s11 = scalar_lea.vmem [#allocation9], %s1032_s23  ;;  %p1036_p11 = scmp.ne.s32.totalorder %s1487_s24, 0 }
  0x6a   : > { %s1775_s14 = scalar_select %p343_p7, %s1487_s24, 1 }
  0x6b   : > { %352 = sbr.rel (%p1036_p11) target bundleno = 121 (0x79), region = 56 }
  0x6c   : > { %s345_s8 = scalar_lea.vmem %s1978_s2, %s1775_s14 }
  0x70   : > { %v1512_v0 = vmov 0.0  }
  0x71   : > { %353 = vst [vmem:[#allocation2 + $0x30] sm:$0xff] %v1512_v0  ;;  %354 = vst [vmem:[#allocation2] sm:$0xff] %v1512_v0 }
  0x72   : > { %355 = vst [vmem:[#allocation2 + $0x58] sm:$0xff] %v1512_v0  ;;  %356 = vst [vmem:[#allocation2 + $0x18] sm:$0xff] %v1512_v0 }
  0x73   : > { %357 = vst [vmem:[#allocation2 + $0x50] sm:$0xff] %v1512_v0  ;;  %358 = vst [vmem:[#allocation2 + $0x68] sm:$0xff] %v1512_v0 }
  0x74   : > { %359 = vst [vmem:[#allocation2 + $0x8] sm:$0xff] %v1512_v0  ;;  %360 = vst [vmem:[#allocation2 + $0x48] sm:$0xff] %v1512_v0 }
  0x75   : > { %361 = vst [vmem:[#allocation2 + $0x40] sm:$0xff] %v1512_v0  ;;  %362 = vst [vmem:[#allocation2 + $0x20] sm:$0xff] %v1512_v0 }
  0x76   : > { %363 = vst [vmem:[#allocation2 + $0x10] sm:$0xff] %v1512_v0  ;;  %364 = vst [vmem:[#allocation2 + $0x38] sm:$0xff] %v1512_v0 }
  0x77   : > { %365 = vst [vmem:[#allocation2 + $0x60] sm:$0xff] %v1512_v0  ;;  %366 = vst [vmem:[#allocation2 + $0x70] sm:$0xff] %v1512_v0 }
  0x78   : > { %367 = vst [vmem:[#allocation2 + $0x78] sm:$0xff] %v1512_v0  ;;  %368 = vst [vmem:[#allocation2 + $0x28] sm:$0xff] %v1512_v0 }
  0x79 PF: > { %v1279_v1 = vld [vmem:[%s1767_s5 + $0x38] sm:$0xff]   ;;  %v1280_v2 = vld [vmem:[%s1767_s5 + $0x30] sm:$0xff]   ;;  %v1281_v3 = vld [vmem:[%s1767_s5 + $0x28] sm:$0xff]   ;;  %p1054_p1 = scmp.ne.s32.totalorder %s1487_s24, 1 }
  0x7a   : > { %1096 = vmatprep.subr.bf16.mxu0 %v1279_v1  ;;  %v1282_v4 = vld [vmem:[%s1767_s5 + $0x20] sm:$0xff]   ;;  %v1794_v6 = vld [vmem:[%s1759_s13 + $0x8] sm:$0xff]  ;;  %v1283_v8 = vld [vmem:[%s1767_s5 + $0x18] sm:$0xff]   ;;  %s2025_s1 = sld [smem:[#allocation24_spill]] (!%p1054_p1) }
  0x7b   : > { %1097 = vmatpush3.bf16.msra.mxu0 %v1279_v1  ;;  %v1791_v5 = vld [vmem:[%s1759_s13] sm:$0xff]  ;;  %v1287_v9 = vld [vmem:[%s1781_s9 + $0x38] sm:$0xff]   ;;  %v1288_v10 = vld [vmem:[%s1781_s9 + $0x30] sm:$0xff]  }
  0x7c   : > { %1098 = vmatprep.subr.bf16.mxu0 %v1280_v2  ;;  %v385_v7 = vpack.c.bf16 %v1794_v6, %v1791_v5  ;;  %v1284_v11 = vld [vmem:[%s1767_s5 + $0x10] sm:$0xff]   ;;  %1128 = vmatprep.subr.bf16.mxu1 %v1287_v9  ;;  %v1289_v12 = vld [vmem:[%s1781_s9 + $0x28] sm:$0xff]   ;;  %v1290_v14 = vld [vmem:[%s1781_s9 + $0x20] sm:$0xff]  }
  0x7d   : > { %1129 = vmatpush3.bf16.msra.mxu1 %v1287_v9  ;;  %v1285_v13 = vld [vmem:[%s1767_s5 + $0x8] sm:$0xff]   ;;  %v1286_v15 = vld [vmem:[%s1767_s5] sm:$0xff]   ;;  %v1291_v16 = vld [vmem:[%s1781_s9 + $0x18] sm:$0xff]  }
  0x7e   : > { %1112 = vmatprep.mubr.bf16.mxu0 %v385_v7  ;;  %1130 = vmatprep.subr.bf16.mxu1 %v1288_v10  ;;  %v1808_v17 = vld [vmem:[%s1759_s13 + $0x10] sm:$0xff]  ;;  %v1811_v18 = vld [vmem:[%s1759_s13 + $0x18] sm:$0xff]  ;;  %v1814_v19 = vld [vmem:[%s1759_s13 + $0x20] sm:$0xff] }
  0x7f   : > { %1099 = vmatpush3.bf16.msra.mxu0 %v1280_v2  ;;  %v1817_v20 = vld [vmem:[%s1759_s13 + $0x28] sm:$0xff]  ;;  %v386_v21 = vpack.c.bf16 %v1811_v18, %v1808_v17  ;;  %v1824_v23 = vld [vmem:[%s1759_s13 + $0x30] sm:$0xff]  ;;  %v1827_v24 = vld [vmem:[%s1759_s13 + $0x38] sm:$0xff] }
  0x80   : > { %1100 = vmatprep.subr.bf16.mxu0 %v1281_v3  ;;  %v387_v22 = vpack.c.bf16 %v1817_v20, %v1814_v19  ;;  %v1830_v25 = vld [vmem:[%s1759_s13 + $0x40] sm:$0xff]  ;;  %v1833_v26 = vld [vmem:[%s1759_s13 + $0x48] sm:$0xff]  ;;  %v388_v27 = vpack.c.bf16 %v1827_v24, %v1824_v23  ;;  %v1840_v29 = vld [vmem:[%s1759_s13 + $0x50] sm:$0xff] }
  0x81   : > { %1131 = vmatpush3.bf16.msra.mxu1 %v1288_v10  ;;  %v389_v28 = vpack.c.bf16 %v1833_v26, %v1830_v25  ;;  %v1843_v30 = vld [vmem:[%s1759_s13 + $0x58] sm:$0xff]  ;;  %v1846_v31 = vld [vmem:[%s1759_s13 + $0x60] sm:$0xff]  ;;  %v1849_v32 = vld [vmem:[%s1759_s13 + $0x68] sm:$0xff] }
  0x82   : > { %1132 = vmatprep.subr.bf16.mxu1 %v1289_v12  ;;  %v390_v33 = vpack.c.bf16 %v1843_v30, %v1840_v29  ;;  %v391_v34 = vpack.c.bf16 %v1849_v32, %v1846_v31  ;;  %v1856_v35 = vld [vmem:[%s1759_s13 + $0x70] sm:$0xff]  ;;  %v1859_v36 = vld [vmem:[%s1759_s13 + $0x78] sm:$0xff]  ;;  %v1293_v39 = vld [vmem:[%s1781_s9 + $0x8] sm:$0xff]  }
  0x83   : > { %1101 = vmatpush3.bf16.msra.mxu0 %v1281_v3  ;;  %v392_v37 = vpack.c.bf16 %v1859_v36, %v1856_v35  ;;  %v1292_v38 = vld [vmem:[%s1781_s9 + $0x10] sm:$0xff]   ;;  %v1294_v40 = vld [vmem:[%s1781_s9] sm:$0xff]  }
  0x84   : > { %1102 = vmatprep.subr.bf16.mxu0 %v1282_v4  ;;  %v1037_v43 = vld [vmem:[%s345_s8] ss:$0 sm:$0xff] }
  0x85   : > { %1133 = vmatpush3.bf16.msra.mxu1 %v1289_v12 }
  0x86   : > { %1134 = vmatprep.subr.bf16.mxu1 %v1290_v14 }
  0x87   : > { %1103 = vmatpush3.bf16.msra.mxu0 %v1282_v4 }
  0x88   : > { %1104 = vmatprep.subr.bf16.mxu0 %v1283_v8 }
  0x89   : > { %1135 = vmatpush3.bf16.msra.mxu1 %v1290_v14 }
  0x8a   : > { %1136 = vmatprep.subr.bf16.mxu1 %v1291_v16 }
  0x8b   : > { %1105 = vmatpush3.bf16.msra.mxu0 %v1283_v8 }
  0x8c   : > { %1106 = vmatprep.subr.bf16.mxu0 %v1284_v11 }
  0x8d   : > { %1137 = vmatpush3.bf16.msra.mxu1 %v1291_v16 }
  0x8e   : > { %1138 = vmatprep.subr.bf16.mxu1 %v1292_v38 }
  0x8f   : > { %1107 = vmatpush3.bf16.msra.mxu0 %v1284_v11 }
  0x90   : > { %1108 = vmatprep.subr.bf16.mxu0 %v1285_v13 }
  0x91   : > { %1139 = vmatpush3.bf16.msra.mxu1 %v1292_v38 }
  0x92   : > { %1140 = vmatprep.subr.bf16.mxu1 %v1293_v39 }
  0x93   : > { %1109 = vmatpush3.bf16.msra.mxu0 %v1285_v13 }
  0x94   : > { %1110 = vmatprep.subr.bf16.mxu0 %v1286_v15 }
  0x95   : > { %1141 = vmatpush3.bf16.msra.mxu1 %v1293_v39 }
  0x96   : > { %1142 = vmatprep.subr.bf16.mxu1 %v1294_v40 }
  0x97   : > { %1111 = vmatpush3.bf16.msra.mxu0 %v1286_v15 }
  0x99   : > { %1143 = vmatpush3.bf16.msra.mxu1 %v1294_v40 }
  0x9a   : > { %1113 = vmatmul.mubr.bf16.vlgmr.msra.gmra.mxu0 %v386_v21 }
  0x9b   : > { %1116 = vmatprep.mubr.bf16.mxu0 %v387_v22 }
  0xa2   : > { %1117 = vmatmul.mubr.bf16.gmra.mxu0 %v388_v27 }
  0xa3   : > { %1120 = vmatprep.mubr.bf16.mxu0 %v389_v28 }
  0xaa   : > { %1121 = vmatmul.mubr.bf16.gmra.mxu0 %v390_v33 }
  0xab   : > { %1124 = vmatprep.mubr.bf16.mxu0 %v391_v34 }
  0xb2   : > { %1125 = vmatmul.mubr.bf16.gmra.mxu0 %v392_v37 }
 0x15a   : > { %v1114_v41 = vpop.f32.mrf.mxu0 }
 0x15b   : > { %v507_v47 = vadd.f32 %v1114_v41, %v1037_v43 }
 0x15c   : > { %v498_v42 = vpop.f32.mrf.mxu0 }
 0x15d   : > { %v499_v45 = vadd.f32 %v1037_v43, %v498_v42  ;;  %v563_v54 = vmax.f32 %v507_v47, 0.0 }
 0x15e   : > { %v1115_v44 = vpop.f32.mrf.mxu0 }
 0x15f   : > { %v510_v46 = vadd.f32 %v1115_v44, %v1037_v43  ;;  %v561_v52 = vmax.f32 %v499_v45, 0.0 }
 0x160   : > { %v501_v48 = vpop.f32.mrf.mxu0 }
 0x161   : > { %v502_v49 = vadd.f32 %v1037_v43, %v501_v48  ;;  %v564_v50 = vmax.f32 %v510_v46, 0.0 }
 0x162   : > { %v1118_v51 = vpop.f32.mrf.mxu0 }
 0x163   : > { %v562_v53 = vmax.f32 %v502_v49, 0.0  ;;  %v594_v57 = vpack.c.bf16 %v564_v50, %v563_v54  ;;  %v523_v61 = vadd.f32 %v1118_v51, %v1037_v43  ;;  %v579_v51 = vld [vmem:[#allocation2 + $0x58] sm:$0xff] }
 0x164   : > { %v514_v55 = vpop.f32.mrf.mxu0 }
 0x165   : > { %v593_v56 = vpack.c.bf16 %v562_v53, %v561_v52  ;;  %v515_v59 = vadd.f32 %v1037_v43, %v514_v55  ;;  %v567_v4 = vmax.f32 %v523_v61, 0.0  ;;  %v577_v53 = vld [vmem:[#allocation2 + $0x30] sm:$0xff]  ;;  %v583_v61 = vld [vmem:[#allocation2 + $0x8] sm:$0xff] }
 0x166   : > { %v1119_v58 = vpop.f32.mrf.mxu0 }
 0x167   : > { %v526_v60 = vadd.f32 %v1119_v58, %v1037_v43  ;;  %1144 = vmatprep.mubr.bf16.mxu1 %v593_v56  ;;  %v565_v2 = vmax.f32 %v515_v59, 0.0  ;;  %v580_v56 = vld [vmem:[#allocation2 + $0x18] sm:$0xff]  ;;  %v578_v59 = vld [vmem:[#allocation2] sm:$0xff] }
 0x168   : > { %v517_v62 = vpop.f32.mrf.mxu0  ;;  %1145 = vmatmul.mubr.bf16.vlgmr.msra.gmra.mxu1 %v594_v57 }
 0x169   : > { %v518_v63 = vadd.f32 %v1037_v43, %v517_v62  ;;  %v568_v0 = vmax.f32 %v526_v60, 0.0 }
 0x16a   : > { %v1122_v1 = vpop.f32.mrf.mxu0 }
 0x16b   : > { %v566_v3 = vmax.f32 %v518_v63, 0.0  ;;  %v596_v9 = vpack.c.bf16 %v568_v0, %v567_v4  ;;  %v539_v13 = vadd.f32 %v1122_v1, %v1037_v43  ;;  %v581_v0 = vld [vmem:[#allocation2 + $0x50] sm:$0xff] }
 0x16c   : > { %v530_v7 = vpop.f32.mrf.mxu0 }
 0x16d   : > { %v595_v8 = vpack.c.bf16 %v566_v3, %v565_v2  ;;  %v531_v11 = vadd.f32 %v1037_v43, %v530_v7  ;;  %v571_v28 = vmax.f32 %v539_v13, 0.0  ;;  %v584_v3 = vld [vmem:[#allocation2 + $0x48] sm:$0xff] }
 0x16e   : > { %v1123_v10 = vpop.f32.mrf.mxu0 }
 0x16f   : > { %v542_v12 = vadd.f32 %v1123_v10, %v1037_v43  ;;  %1148 = vmatprep.mubr.bf16.mxu1 %v595_v8  ;;  %v569_v22 = vmax.f32 %v531_v11, 0.0  ;;  %v582_v8 = vld [vmem:[#allocation2 + $0x68] sm:$0xff]  ;;  %v587_v11 = vld [vmem:[#allocation2 + $0x10] sm:$0xff] }
 0x170   : > { %v533_v14 = vpop.f32.mrf.mxu0  ;;  %1149 = vmatmul.mubr.bf16.gmra.mxu1 %v596_v9 }
 0x171   : > { %v534_v15 = vadd.f32 %v1037_v43, %v533_v14  ;;  %v572_v16 = vmax.f32 %v542_v12, 0.0  ;;  %v585_v14 = vld [vmem:[#allocation2 + $0x40] sm:$0xff] }
 0x172   : > { %v1126_v21 = vpop.f32.mrf.mxu0 }
 0x173   : > { %v570_v27 = vmax.f32 %v534_v15, 0.0  ;;  %v598_v37 = vpack.c.bf16 %v572_v16, %v571_v28  ;;  %v555_v41 = vadd.f32 %v1126_v21, %v1037_v43  ;;  %v588_v21 = vld [vmem:[#allocation2 + $0x38] sm:$0xff]  ;;  %v586_v28 = vld [vmem:[#allocation2 + $0x20] sm:$0xff] }
 0x174   : > { %v546_v33 = vpop.f32.mrf.mxu0 }
 0x175   : > { %v597_v34 = vpack.c.bf16 %v570_v27, %v569_v22  ;;  %v547_v39 = vadd.f32 %v1037_v43, %v546_v33  ;;  %v575_v48 = vmax.f32 %v555_v41, 0.0 }
 0x176   : > { %v1127_v38 = vpop.f32.mrf.mxu0 }
 0x177   : > { %v558_v40 = vadd.f32 %v1127_v38, %v1037_v43  ;;  %1152 = vmatprep.mubr.bf16.mxu1 %v597_v34  ;;  %v573_v46 = vmax.f32 %v547_v39, 0.0 }
 0x178   : > { %v549_v42 = vpop.f32.mrf.mxu0  ;;  %1153 = vmatmul.mubr.bf16.gmra.mxu1 %v598_v37  ;;  %v591_v37 = vld [vmem:[#allocation2 + $0x78] sm:$0xff] }
 0x179   : > { %v550_v44 = vadd.f32 %v1037_v43, %v549_v42  ;;  %v576_v45 = vmax.f32 %v558_v40, 0.0  ;;  %v589_v40 = vld [vmem:[#allocation2 + $0x60] sm:$0xff] }
 0x17b   : > { %v574_v47 = vmax.f32 %v550_v44, 0.0  ;;  %v600_v50 = vpack.c.bf16 %v576_v45, %v575_v48  ;;  %v592_v44 = vld [vmem:[#allocation2 + $0x28] sm:$0xff] }
 0x17d   : > { %v599_v49 = vpack.c.bf16 %v574_v47, %v573_v46  ;;  %v590_v47 = vld [vmem:[#allocation2 + $0x70] sm:$0xff] }
 0x17f   : > { %1156 = vmatprep.mubr.bf16.mxu1 %v599_v49 }
 0x180   : > { %1157 = vmatmul.mubr.bf16.gmra.mxu1 %v600_v50 }
 0x228   : > { %v1146_v52 = vpop.f32.mrf.mxu1 }
 0x229   : > { %v764_v54 = vadd.f32 %v1146_v52, %v579_v51 }
 0x22a   : > { %v699_v55 = vpop.f32.mrf.mxu1 }
 0x22b   : > { %780 = vst [vmem:[#allocation2 + $0x58] sm:$0xff] %v764_v54  ;;  %v762_v57 = vadd.f32 %v699_v55, %v577_v53 }
 0x22c   : > { %v1147_v58 = vpop.f32.mrf.mxu1 }
 0x22d   : > { %778 = vst [vmem:[#allocation2 + $0x30] sm:$0xff] %v762_v57  ;;  %v765_v43 = vadd.f32 %v1147_v58, %v580_v56 }
 0x22e   : > { %v702_v60 = vpop.f32.mrf.mxu1 }
 0x22f   : > { %781 = vst [vmem:[#allocation2 + $0x18] sm:$0xff] %v765_v43  ;;  %v763_v62 = vadd.f32 %v702_v60, %v578_v59 }
 0x230   : > { %v1150_v63 = vpop.f32.mrf.mxu1 }
 0x231   : > { %779 = vst [vmem:[#allocation2] sm:$0xff] %v763_v62  ;;  %v768_v1 = vadd.f32 %v1150_v63, %v583_v61 }
 0x232   : > { %v715_v2 = vpop.f32.mrf.mxu1 }
 0x233   : > { %784 = vst [vmem:[#allocation2 + $0x8] sm:$0xff] %v768_v1  ;;  %v766_v4 = vadd.f32 %v715_v2, %v581_v0 }
 0x234   : > { %v1151_v7 = vpop.f32.mrf.mxu1 }
 0x235   : > { %782 = vst [vmem:[#allocation2 + $0x50] sm:$0xff] %v766_v4  ;;  %v769_v9 = vadd.f32 %v1151_v7, %v584_v3 }
 0x236   : > { %v718_v10 = vpop.f32.mrf.mxu1 }
 0x237   : > { %785 = vst [vmem:[#allocation2 + $0x48] sm:$0xff] %v769_v9  ;;  %v767_v12 = vadd.f32 %v718_v10, %v582_v8 }
 0x238   : > { %v1154_v13 = vpop.f32.mrf.mxu1 }
 0x239   : > { %783 = vst [vmem:[#allocation2 + $0x68] sm:$0xff] %v767_v12  ;;  %v772_v15 = vadd.f32 %v1154_v13, %v587_v11 }
 0x23a   : > { %v731_v16 = vpop.f32.mrf.mxu1 }
 0x23b   : > { %788 = vst [vmem:[#allocation2 + $0x10] sm:$0xff] %v772_v15  ;;  %v770_v22 = vadd.f32 %v731_v16, %v585_v14 }
 0x23c   : > { %v1155_v27 = vpop.f32.mrf.mxu1 }
 0x23d   : > { %786 = vst [vmem:[#allocation2 + $0x40] sm:$0xff] %v770_v22  ;;  %v773_v33 = vadd.f32 %v1155_v27, %v588_v21 }
 0x23e   : > { %v734_v34 = vpop.f32.mrf.mxu1 }
 0x23f   : > { %789 = vst [vmem:[#allocation2 + $0x38] sm:$0xff] %v773_v33  ;;  %v771_v38 = vadd.f32 %v734_v34, %v586_v28 }
 0x240   : > { %v1158_v39 = vpop.f32.mrf.mxu1 }
 0x241   : > { %787 = vst [vmem:[#allocation2 + $0x20] sm:$0xff] %v771_v38  ;;  %v776_v41 = vadd.f32 %v1158_v39, %v591_v37 }
 0x242   : > { %v747_v42 = vpop.f32.mrf.mxu1 }
 0x243   : > { %792 = vst [vmem:[#allocation2 + $0x78] sm:$0xff] %v776_v41  ;;  %v774_v45 = vadd.f32 %v747_v42, %v589_v40 }
 0x244   : > { %v1159_v46 = vpop.f32.mrf.mxu1 }
 0x245   : > { %790 = vst [vmem:[#allocation2 + $0x60] sm:$0xff] %v774_v45  ;;  %v777_v48 = vadd.f32 %v1159_v46, %v592_v44  ;;  %797 = sbr.rel (%p1054_p1) target bundleno = 600 (0x258), region = 60 }
 0x246   : > { %v750_v49 = vpop.f32.mrf.mxu1 }
 0x247   : > { %793 = vst [vmem:[#allocation2 + $0x28] sm:$0xff] %v777_v48  ;;  %v775_v50 = vadd.f32 %v750_v49, %v590_v47 }
 0x249   : > { %791 = vst [vmem:[#allocation2 + $0x70] sm:$0xff] %v775_v50 }
 0x24a   : > { %v798_v51 = vld [vmem:[#allocation2 + $0x30] sm:$0xff]  ;;  %v1055_v52 = vld [vmem:[%s2025_s1] ss:$0 sm:$0xff]  ;;  %v800_v56 = vld [vmem:[#allocation2 + $0x58] sm:$0xff] }
 0x24b   : > { %v799_v53 = vld [vmem:[#allocation2] sm:$0xff]  ;;  %v821_v54 = vadd.f32 %v1055_v52, %v798_v51  ;;  %v801_v57 = vld [vmem:[#allocation2 + $0x18] sm:$0xff]  ;;  %v802_v58 = vld [vmem:[#allocation2 + $0x50] sm:$0xff]  ;;  %v823_v59 = vadd.f32 %v1055_v52, %v800_v56 }
 0x24c   : > { %v822_v55 = vadd.f32 %v1055_v52, %v799_v53  ;;  %v824_v43 = vadd.f32 %v1055_v52, %v801_v57  ;;  %v825_v60 = vadd.f32 %v1055_v52, %v802_v58  ;;  %v803_v61 = vld [vmem:[#allocation2 + $0x68] sm:$0xff]  ;;  %v806_v4 = vld [vmem:[#allocation2 + $0x40] sm:$0xff]  ;;  %v808_v8 = vld [vmem:[#allocation2 + $0x10] sm:$0xff] }
 0x24d   : > { %v804_v62 = vld [vmem:[#allocation2 + $0x8] sm:$0xff]  ;;  %v837_v0 = vadd.f32 %v821_v54, %v1791_v5  ;;  %v826_v2 = vadd.f32 %v1055_v52, %v803_v61  ;;  %v807_v7 = vld [vmem:[#allocation2 + $0x20] sm:$0xff]  ;;  %v839_v9 = vadd.f32 %v823_v59, %v1808_v17  ;;  %v809_v13 = vld [vmem:[#allocation2 + $0x38] sm:$0xff]  ;;  %v829_v16 = vadd.f32 %v1055_v52, %v806_v4 }
 0x24e   : > { %v805_v63 = vld [vmem:[#allocation2 + $0x48] sm:$0xff]  ;;  %v838_v1 = vadd.f32 %v822_v55, %v1794_v6  ;;  %v827_v3 = vadd.f32 %v1055_v52, %v804_v62  ;;  %v840_v10 = vadd.f32 %v824_v43, %v1811_v18  ;;  %v841_v11 = vadd.f32 %v825_v60, %v1814_v19  ;;  %v810_v14 = vld [vmem:[#allocation2 + $0x60] sm:$0xff]  ;;  %v812_v21 = vld [vmem:[#allocation2 + $0x78] sm:$0xff] }
 0x24f   : > { %v828_v12 = vadd.f32 %v1055_v52, %v805_v63  ;;  %853 = vst [vmem:[%s1783_s11] sm:$0xff] %v837_v0  ;;  %v842_v6 = vadd.f32 %v826_v2, %v1817_v20  ;;  %v830_v17 = vadd.f32 %v1055_v52, %v807_v7  ;;  %v813_v18 = vld [vmem:[#allocation2 + $0x28] sm:$0xff]  ;;  %855 = vst [vmem:[%s1783_s11 + $0x10] sm:$0xff] %v839_v9 }
 0x250   : > { %v811_v5 = vld [vmem:[#allocation2 + $0x70] sm:$0xff]  ;;  %854 = vst [vmem:[%s1783_s11 + $0x8] sm:$0xff] %v838_v1  ;;  %v843_v15 = vadd.f32 %v827_v3, %v1824_v23  ;;  %856 = vst [vmem:[%s1783_s11 + $0x18] sm:$0xff] %v840_v10  ;;  %v831_v22 = vadd.f32 %v1055_v52, %v808_v8  ;;  %v832_v27 = vadd.f32 %v1055_v52, %v809_v13 }
 0x251   : > { %857 = vst [vmem:[%s1783_s11 + $0x20] sm:$0xff] %v841_v11  ;;  %v844_v19 = vadd.f32 %v828_v12, %v1827_v24  ;;  %v833_v28 = vadd.f32 %v1055_v52, %v810_v14  ;;  %858 = vst [vmem:[%s1783_s11 + $0x28] sm:$0xff] %v842_v6  ;;  %v845_v20 = vadd.f32 %v829_v16, %v1830_v25 }
 0x252   : > { %859 = vst [vmem:[%s1783_s11 + $0x30] sm:$0xff] %v843_v15  ;;  %v846_v23 = vadd.f32 %v830_v17, %v1833_v26  ;;  %v834_v33 = vadd.f32 %v1055_v52, %v811_v5  ;;  %v835_v34 = vadd.f32 %v1055_v52, %v812_v21  ;;  %v847_v24 = vadd.f32 %v831_v22, %v1840_v29 }
 0x253   : > { %860 = vst [vmem:[%s1783_s11 + $0x38] sm:$0xff] %v844_v19  ;;  %v848_v37 = vadd.f32 %v832_v27, %v1843_v30  ;;  %v849_v38 = vadd.f32 %v833_v28, %v1846_v31  ;;  %v836_v39 = vadd.f32 %v1055_v52, %v813_v18  ;;  %861 = vst [vmem:[%s1783_s11 + $0x40] sm:$0xff] %v845_v20 }
 0x254   : > { %862 = vst [vmem:[%s1783_s11 + $0x48] sm:$0xff] %v846_v23  ;;  %v850_v40 = vadd.f32 %v834_v33, %v1849_v32  ;;  %v851_v25 = vadd.f32 %v835_v34, %v1856_v35  ;;  %863 = vst [vmem:[%s1783_s11 + $0x50] sm:$0xff] %v847_v24 }
 0x255   : > { %864 = vst [vmem:[%s1783_s11 + $0x58] sm:$0xff] %v848_v37  ;;  %865 = vst [vmem:[%s1783_s11 + $0x60] sm:$0xff] %v849_v38  ;;  %v852_v26 = vadd.f32 %v836_v39, %v1859_v36 }
 0x256   : > { %866 = vst [vmem:[%s1783_s11 + $0x68] sm:$0xff] %v850_v40  ;;  %867 = vst [vmem:[%s1783_s11 + $0x70] sm:$0xff] %v851_v25 }
 0x257   : > { %868 = vst [vmem:[%s1783_s11 + $0x78] sm:$0xff] %v852_v26 }
 0x258 PF: > { %s2026_s24 = sld [smem:[#allocation15_spill]]  ;;  %s883_s6 = sshll.u32 %s1783_s11, 4  ;;  %s1914_s6 = int_to_ptr.vmem [resolvable:$true] %s883_s6 }
 0x259   : > { %s2028_s13 = sld [smem:[#allocation25_spill]]  ;;  %s870_s17 = scalar_lea.sflag [#allocation5], %s1755_s7 }
 0x25a   : > { %s1379_s25 = scalar_lea.vmem %s1914_s6, 2048  ;;  %s1513_s5 = smov [#allocation9]  }
 0x25b   : > { %p1380_p10 = scmp.ne.s32.totalorder %s1914_s6, %s1379_s25  ;;  %s1383_s14 = sshll.u32 %s1513_s5, 4  ;;  %s1384_s14 = int_to_ptr.vmem [resolvable:$false] %s1383_s14 }
 0x25c   : > { %s1385_s30 = scalar_lea.vmem %s1384_s14, 4096  ;;  %p1386_p8 = scmp.lt.s32.totalorder %s1914_s6, %s1384_s14 }
 0x25d   : > { %p1381_p3 = pnand %p1380_p10, %p1705_p0  ;;  %p1387_p9 = scmp.lt.s32.totalorder %s1385_s30, %s1379_s25 }
 0x25e   : > { %s1063_s0 = sshll.u32 %s2026_s24, 11 }
 0x25f   : > { %s1911_s29 = scalar_lea.hbm %s2028_s13, %s1063_s0  ;;  %p1382_p5 = pneg %p1381_p3 }
 0x260   : > { %p1388_p13 = por %p1387_p9, %p1386_p8 }
 0x262   : > { %p1389_p2 = pnand %p1388_p13, %p1382_p5 }
 0x264   : > { %1392 = shalt.err (!%p1389_p2)
}
 0x265   : > { %s1393_s18 = scalar_lea.hbm %s1911_s29, 2048  ;;  %s1397_s11 = scalar_lea.hbm %s2028_s13, 4096 }
 0x266   : > { %p1394_p12 = scmp.ne.s32.totalorder %s1911_s29, %s1393_s18  ;;  %p1398_p7 = scmp.lt.s32.totalorder %s1911_s29, %s2028_s13 }
 0x267   : > { %p1399_p11 = scmp.lt.s32.totalorder %s1397_s11, %s1393_s18 }
 0x268   : > { %p1395_p6 = pnand %p1394_p12, %p1705_p0 }
 0x269   : > { %p1400_p1 = por %p1399_p11, %p1398_p7 }
 0x26a   : > { %p1396_p4 = pneg %p1395_p6 }
 0x26c   : > { %p1401_p10 = pnand %p1400_p1, %p1396_p4 }
 0x26e   : > { %1404 = shalt.err (!%p1401_p10)
}
 0x26f   : > { %s1514_s27 = smov 128   ;;  %s1515_s15 = smov 8  }
 0x270   : > { %1166 = dma.vmem_to_hbm [thread:$0]  (%p1705_p0), %s1914_s6, 2048, %s1911_s29, %s870_s17, %s1514_s27, %s1514_s27, %s1515_s15  }
 0x271 PF: > { %p1183_p3 = scmp.ge.s32.totalorder %s1503_s28, 2  ;;  %s898_s1 = sand.u32 1, %s1475_s21  }
 0x272   : > { %p2029_p5 = scmp.ne.s32.totalorder %s2017_s20, 0  ;;  %s899_s24 = scalar_lea.sflag [#allocation5], %s898_s1 }
 0x274   : > { %p1179_p8 = pnand %p1183_p3, %p2029_p5 }
 0x276   : > { %p1180_p9 = pneg %p1179_p8 }
 0x278   : > { %1458 = dma.done.wait (%p1180_p9), %s899_s24, 2048  }
 0x279   : > { %1460 = vsyncadd (%p1180_p9), %s899_s24, 4294965248  ;;  %s24_s28 = sadd.s32 1, %s1503_s28   ;;  %s2030_s0 = sld [smem:[#allocation13_spill]] }
 0x27a   : > { %p21_p13 = scmp.ge.s32.totalorder %s24_s28, 6   ;;  %s2031_s20 = sld [smem:[#allocation18_spill]] }
 0x27b   : > { %s2032_s7 = sld [smem:[#allocation14_spill]]  ;;  %s2037_s18 = smov %s1467_s19 }
 0x27c   : > { %s2033_s23 = sld [smem:[#allocation21_spill]]  ;;  %s2039_s21 = smov %s1479_s22 }
 0x27d   : > { %s2034_s25 = sld [smem:[#allocation16_spill]]  ;;  %s2041_s24 = smov %s1495_s26 }
 0x27e   : > { %s2035_s12 = sld [smem:[#allocation17_spill]] }
 0x27f   : > { %s2036_s27 = sld [smem:[#allocation19_spill]]  ;;  %s2038_s19 = smov %s2030_s0 }
 0x280   :  { %23 = sbr.rel (!%p21_p13) target bundleno = 16 (0x10), region = 120 }
 0x281   : > { %s2040_s22 = smov %s2032_s7 }
 0x284   : > { %s2042_s26 = smov %s2035_s12 }
 0x285   :  { %904 = vsyncpa [#allocation4], 1 }
 0x286   :  { %906 = vsyncpa [#allocation4 + $0x1], 1 }
 0x287   :  { %907 = vsyncpa [#allocation7], 1 }
 0x288   :  { %909 = vsyncpa [#allocation7 + $0x1], 1 }
 0x289   :  { %910 = vsyncpa [#allocation5], 1 }
 0x28a   :  { %912 = vsyncpa [#allocation5 + $0x1], 1 }

// kernel: tpu_custom_call.1
= control target key start
LH: loop header
LB: loop body
LE: loop exit
PB: predicated region body
PF: predicated region fallthrough
CT: control target
= control target key end

     0   :  { %s1976_s0 = inlined_call_operand.hbm [shape: f32[256,128], index: 0, kind: input, shape index: {}]   ;;  %s1977_s1 = inlined_call_operand.hbm [shape: bf16[128,256], index: 1, kind: input, shape index: {}]   ;;  %s1978_s2 = inlined_call_operand.vmem [shape: f32[1,256], index: 2, kind: input, shape index: {}]   ;;  %s1979_s3 = inlined_call_operand.hbm [shape: bf16[256,128], index: 3, kind: input, shape index: {}]   ;;  %s1980_s4 = inlined_call_operand.vmem [shape: f32[1,128], index: 4, kind: input, shape index: {}]   ;;  %s1981_s5 = inlined_call_operand.hbm [shape: f32[256,128], index: 5, kind: output, shape index: {}]  }
   0x1   :  { %1995 = sst [smem:[#allocation22_spill]] %s1976_s0 }
   0x2   :  { %1996 = sst [smem:[#allocation23_spill]] %s1977_s1 }
   0x3   :  { %1997 = sst [smem:[#allocation24_spill]] %s1980_s4 }
   0x4   :  { %1998 = sst [smem:[#allocation25_spill]] %s1981_s5 }
   0x5   :  { %10 = vsyncpa [#allocation4], 0 }
   0x6   :  { %12 = vsyncpa [#allocation4 + $0x1], 0 }
   0x7   :  { %13 = vsyncpa [#allocation7], 0 }
   0x8   :  { %15 = vsyncpa [#allocation7 + $0x1], 0 }
   0x9   :  { %16 = vsyncpa [#allocation5], 0 }
   0xa   :  { %18 = vsyncpa [#allocation5 + $0x1], 0  ;;  %s1546_s18 = smov 0   ;;  %s1548_s19 = smov 0  }
   0xb   :  { %s1550_s20 = smov 0   ;;  %s1552_s21 = smov 0  }
   0xc   :  { %s1554_s22 = smov 0   ;;  %s1556_s23 = smov 0  }
   0xd   :  { %s1558_s24 = smov 0   ;;  %s1560_s25 = smov 0  }
   0xe   :  { %s1562_s26 = smov 0   ;;  %s1564_s27 = smov 0  }
   0xf   :  { %s1566_s28 = smov 0  }
  0x10 LB: > { %1999 = sst [smem:[#allocation13_spill]] %s1471_s20  ;;  %s33_s29 = sadd.s32 1, %s1495_s26  ;;  %s1503_s28 = sphi %s1566_s28, %s24_s28   ;;  %s1499_s27 = sphi %s1564_s27, %s2036_s27   ;;  %s1495_s26 = sphi %s1562_s26, %s2042_s26   ;;  %s1491_s25 = sphi %s1560_s25, %s2034_s25   ;;  %s1487_s24 = sphi %s1558_s24, %s2041_s24   ;;  %s1483_s23 = sphi %s1556_s23, %s2033_s23   ;;  %s1479_s22 = sphi %s1554_s22, %s2040_s22   ;;  %s1475_s21 = sphi %s1552_s21, %s2039_s21   ;;  %s1471_s20 = sphi %s1550_s20, %s2031_s20   ;;  %s1467_s19 = sphi %s1548_s19, %s2038_s19   ;;  %s1463_s18 = sphi %s1546_s18, %s2037_s18  }
  0x11   : > { %2000 = sst [smem:[#allocation14_spill]] %s1483_s23  ;;  %p51_p0 = scmp.eq.s32.totalorder %s1503_s28, 0 }
  0x12   : > { %2001 = sst [smem:[#allocation15_spill]] %s1491_s25  ;;  %p1603_p1 = scmp.ge.s32.totalorder %s33_s29, 2 }
  0x13   : > { %2002 = sst [smem:[#allocation16_spill]] %s1499_s27  ;;  %s69_s6 = sadd.s32 1, %s1471_s20 }
  0x14   : > { %p76_p2 = scmp.ne.s32.totalorder %s1471_s20, %s1467_s19  ;;  %p82_p3 = scmp.ne.s32.totalorder %s1467_s19, %s1463_s18 }
  0x15   : > { %s2044_s29 = smov (%p1603_p1, %s33_s29), 0  ;;  %p1987_p5 = scmp.lt.s32.totalorder %s1503_s28, 4 }
  0x16   : > { %2004 = sst [smem:[#allocation17_spill]] %s2044_s29  ;;  %p1618_p4 = por %p76_p2, %p51_p0 }
  0x17   : > { %s66_s8 = ssub.s32 %s1495_s26, %s2044_s29  ;;  %s229_s9 = sand.u32 1, %s1503_s28  }
  0x18   : > { %p67_p6 = scmp.eq.s32.totalorder %s66_s8, 0  ;;  %s231_s10 = sand.u32 1, %s1471_s20  }
  0x19   : > { %s1630_s12 = sshll.u32 %s231_s10, 6  ;;  %s1027_s13 = sshll.u32 %s1495_s26, 6 }
  0x1a   : > { %s1628_s11 = scalar_select %p67_p6, %s1471_s20, %s69_s6  }
  0x1b   : > { %s2007_s1 = sld [smem:[#allocation23_spill]]  ;;  %s233_s17 = scalar_lea.vmem [#allocation6], %s1630_s12 }
  0x1c   : > { %2006 = sst [smem:[#allocation18_spill]] %s1628_s11  ;;  %s239_s5 = sshll.u32 %s233_s17, 4  ;;  %s240_s5 = int_to_ptr.vmem [resolvable:$true] %s239_s5 }
  0x1d   : > { %p1641_p7 = pnand %p1987_p5, %p1618_p4  ;;  %p1031_p8 = scmp.ge.s32.totalorder %s1503_s28, 1 }
  0x1e   : > { %s1646_s6 = scalar_lea.sflag [#allocation7], %s229_s9  ;;  %s1308_s8 = scalar_lea.vmem %s240_s5, 1024 }
  0x1f   : > { %p1986_p9 = pneg %p1641_p7  ;;  %p1309_p10 = scmp.ne.s32.totalorder %s240_s5, %s1308_s8 }
  0x20   : > { %s1505_s10 = smov [#allocation6]  }
  0x21   : > { %s238_s16 = scalar_lea.hbm %s2007_s1, %s1027_s13  ;;  %p1311_p11 = pnand %p1309_p10, %p1986_p9 }
  0x22   : > { %s1313_s7 = sshll.u32 %s1505_s10, 4  ;;  %s1314_s7 = int_to_ptr.vmem [resolvable:$false] %s1313_s7 }
  0x23   : > { %p1312_p12 = pneg %p1311_p11  ;;  %s1315_s13 = scalar_lea.vmem %s1314_s7, 2048 }
  0x24   : > { %p1316_p13 = scmp.lt.s32.totalorder %s240_s5, %s1314_s7  ;;  %p1317_p2 = scmp.lt.s32.totalorder %s1315_s13, %s1308_s8 }
  0x26   : > { %p1318_p4 = por %p1317_p2, %p1316_p13 }
  0x28   : > { %p1319_p6 = pnand %p1318_p4, %p1312_p12 }
  0x2a   : > { %1322 = shalt.err (!%p1319_p6)
}
  0x2b   : > { %s1988_s14 = smov 128   ;;  %s1984_s9 = smov 64  }
  0x2c   : > { %s1985_s15 = smov 4   ;;  %p274_p10 = scmp.lt.s32.totalorder %s1503_s28, 5 }
  0x2d   : > { %1174 = dma.hbm_to_vmem [thread:$0]  (!%p1641_p7), %s238_s16, 1024, %s240_s5, %s1646_s6, %s1988_s14, %s1984_s9, %s1985_s15  }
  0x2e   : > { %p1662_p11 = pnand %p1031_p8, %p274_p10  ;;  %s1667_s8 = sadd.s32 4294967295, %s1503_s28  }
  0x2f   : > { %s1020_s10 = sadd.s32 4294967294, %s1503_s28   ;;  %s36_s7 = sadd.s32 1, %s1499_s27 }
  0x30   : > { %s43_s13 = sadd.s32 1, %s1483_s23  ;;  %s2046_s7 = smov (!%p1603_p1, %s36_s7), %s1499_s27 }
  0x31   : > { %p50_p12 = scmp.ne.s32.totalorder %s1483_s23, %s1479_s22  ;;  %p56_p13 = scmp.ne.s32.totalorder %s1479_s22, %s1475_s21 }
  0x32   : > { %p38_p8 = scmp.ge.s32.totalorder %s2046_s7, 2  ;;  %p57_p2 = scmp.eq.s32.totalorder %s1667_s8, 0 }
  0x33   : > { %p1682_p4 = por %p51_p0, %p50_p12  ;;  %p179_p6 = scmp.eq.s32.totalorder %s1667_s8, 3 }
  0x34   : > { %s2048_s7 = smov (%p38_p8, %s2046_s7), 0  ;;  %p1692_p1 = por %p57_p2, %p56_p13 }
  0x35   : > { %2011 = sst [smem:[#allocation19_spill]] %s2048_s7  ;;  %p1699_p10 = por %p82_p3, %p57_p2 }
  0x36   : > { %s40_s9 = ssub.s32 %s1499_s27, %s2048_s7  ;;  %p1705_p0 = por %p179_p6, %p50_p12 }
  0x37   : > { %p41_p9 = scmp.eq.s32.totalorder %s40_s9, 0  ;;  %p185_p5 = scmp.eq.s32.totalorder %s1020_s10, 3 }
  0x38   : > { %s2014_s15 = scalar_select %p1705_p0, 1, 0 }
  0x39   : > { %s208_s14 = sand.u32 1, %s1483_s23   ;;  %s1061_s1 = sshll.u32 %s1499_s27, 11 }
  0x3a   : > { %2015 = sst [smem:[#allocation20_spill]] %s2014_s15  ;;  %p1717_p8 = por %p185_p5, %p56_p13 }
  0x3b   : > { %s1712_s11 = scalar_select %p41_p9, %s1483_s23, %s43_s13  }
  0x3c   : > { %s2017_s20 = scalar_select %p1717_p8, 1, 0 }
  0x3d   : > { %2016 = sst [smem:[#allocation21_spill]] %s1712_s11  ;;  %s1023_s18 = sshll.u32 %s208_s14, 7 }
  0x3e   : > { %s2018_s0 = sld [smem:[#allocation22_spill]]  ;;  %p2019_p3 = scmp.lt.s32.totalorder %s1503_s28, 4 }
  0x3f   : > { %s212_s9 = scalar_lea.vmem [#allocation3], %s1023_s18  ;;  %s209_s13 = scalar_lea.sflag [#allocation4], %s208_s14 }
  0x40   : > { %p1728_p12 = pnand %p2019_p3, %p1682_p4  ;;  %s219_s10 = sshll.u32 %s212_s9, 4  ;;  %s220_s10 = int_to_ptr.vmem [resolvable:$true] %s219_s10 }
  0x41   : > { %s1336_s27 = scalar_lea.vmem %s220_s10, 2048  ;;  %s1509_s11 = smov [#allocation3]  }
  0x42   : > { %p1325_p5 = pneg %p1728_p12  ;;  %p1337_p9 = scmp.ne.s32.totalorder %s220_s10, %s1336_s27 }
  0x43   : > { %s1341_s4 = sshll.u32 %s1509_s11, 4  ;;  %s1342_s4 = int_to_ptr.vmem [resolvable:$false] %s1341_s4 }
  0x44   : > { %s218_s7 = scalar_lea.hbm %s2018_s0, %s1061_s1  ;;  %p1339_p13 = pnand %p1337_p9, %p1325_p5 }
  0x45   : > { %s1343_s1 = scalar_lea.vmem %s1342_s4, 4096  ;;  %p1344_p6 = scmp.lt.s32.totalorder %s220_s10, %s1342_s4 }
  0x46   : > { %p1340_p2 = pneg %p1339_p13  ;;  %p1345_p4 = scmp.lt.s32.totalorder %s1343_s1, %s1336_s27 }
  0x48   : > { %p1346_p3 = por %p1345_p4, %p1344_p6 }
  0x4a   : > { %p1347_p8 = pnand %p1346_p3, %p1340_p2 }
  0x4c   : > { %1350 = shalt.err (!%p1347_p8)
}
  0x4d   : > { %s1510_s25 = smov 8   ;;  %s2021_s5 = smov 128  }
  0x4e   : > { %1171 = dma.hbm_to_vmem [thread:$0]  (!%p1728_p12), %s218_s7, 2048, %s220_s10, %s209_s13, %s2021_s5, %s2021_s5, %s1510_s25  }
  0x4f   : > { %s1062_s14 = sshll.u32 %s1495_s26, 10  ;;  %s259_s0 = scalar_lea.vmem [#allocation8], %s1630_s12 }
  0x50   : > { %s265_s11 = scalar_lea.hbm %s1979_s3, %s1062_s14  ;;  %s266_s4 = sshll.u32 %s259_s0, 4  ;;  %s267_s4 = int_to_ptr.vmem [resolvable:$true] %s266_s4 }
  0x51   : > { %s1364_s27 = scalar_lea.vmem %s267_s4, 1024  ;;  %p2022_p8 = pneg %p1641_p7 }
  0x52   : > { %p1365_p5 = scmp.ne.s32.totalorder %s267_s4, %s1364_s27  ;;  %s1511_s15 = smov [#allocation8]  }
  0x53   : > { %s1369_s1 = sshll.u32 %s1511_s15, 4  ;;  %s1370_s1 = int_to_ptr.vmem [resolvable:$false] %s1369_s1 }
  0x54   : > { %p1367_p9 = pnand %p1365_p5, %p2022_p8  ;;  %s1371_s23 = scalar_lea.vmem %s1370_s1, 2048 }
  0x55   : > { %p1372_p2 = scmp.lt.s32.totalorder %s267_s4, %s1370_s1  ;;  %p1373_p12 = scmp.lt.s32.totalorder %s1371_s23, %s1364_s27 }
  0x56   : > { %p1368_p13 = pneg %p1367_p9 }
  0x57   : > { %p1374_p6 = por %p1373_p12, %p1372_p2 }
  0x59   : > { %p1375_p4 = pnand %p1374_p6, %p1368_p13 }
  0x5b   : > { %1378 = shalt.err (!%p1375_p4)
}
  0x5c   : > { %s2023_s12 = smov 4   ;;  %s2024_s0 = smov 64  }
  0x5d   : > { %1177 = dma.hbm_to_vmem [thread:$0]  (!%p1641_p7), %s265_s11, 1024, %s267_s4, %s1646_s6, %s2024_s0, %s2024_s0, %s2023_s12  }
  0x5e   : > { %278 = sbr.rel (%p1662_p11) target bundleno = 625 (0x271), region = 40  ;;  %s1755_s7 = sand.u32 (!%p1662_p11), 1, %s1479_s22  }
  0x5f   : > { %s1032_s23 = sshll.u32 (!%p1662_p11), %s1755_s7, 7  ;;  %s281_s10 = scalar_lea.sflag (!%p1662_p11), [#allocation4], %s1755_s7 }
  0x60   : > { %s1759_s13 = scalar_lea.vmem (!%p1662_p11), [#allocation3], %s1032_s23 }
  0x63   : > { %1450 = dma.done.wait (%p1692_p1), %s281_s10, 2048  }
  0x64   : > { %1452 = vsyncadd (%p1692_p1), %s281_s10, 4294965248  ;;  %s289_s29 = sand.u32 1, %s1667_s8   ;;  %s291_s6 = sand.u32 1, %s1467_s19  }
  0x65   : > { %s1033_s17 = sshll.u32 %s291_s6, 6  ;;  %s290_s25 = scalar_lea.sflag [#allocation7], %s289_s29 }
  0x66   : > { %s1767_s5 = scalar_lea.vmem [#allocation6], %s1033_s17 }
  0x67   : > { %1454 = dma.done.wait (%p1699_p10), %s290_s25, 2048  }
  0x68   : > { %1456 = vsyncadd (%p1699_p10), %s290_s25, 4294965248  ;;  %p343_p7 = scmp.lt.s32.totalorder %s1487_s24, 1  ;;  %s1781_s9 = scalar_lea.vmem [#allocation8], %s1033_s17 }
  0x69   : > { %s1783_s11 = scalar_lea.vmem [#allocation9], %s1032_s23  ;;  %p1036_p11 = scmp.ne.s32.totalorder %s1487_s24, 0 }
  0x6a   : > { %s1775_s14 = scalar_select %p343_p7, %s1487_s24, 1 }
  0x6b   : > { %352 = sbr.rel (%p1036_p11) target bundleno = 121 (0x79), region = 56 }
  0x6c   : > { %s345_s8 = scalar_lea.vmem %s1978_s2, %s1775_s14 }
  0x70   : > { %v1512_v0 = vmov 0.0  }
  0x71   : > { %353 = vst [vmem:[#allocation2 + $0x30] sm:$0xff] %v1512_v0  ;;  %354 = vst [vmem:[#allocation2] sm:$0xff] %v1512_v0 }
  0x72   : > { %355 = vst [vmem:[#allocation2 + $0x58] sm:$0xff] %v1512_v0  ;;  %356 = vst [vmem:[#allocation2 + $0x18] sm:$0xff] %v1512_v0 }
  0x73   : > { %357 = vst [vmem:[#allocation2 + $0x50] sm:$0xff] %v1512_v0  ;;  %358 = vst [vmem:[#allocation2 + $0x68] sm:$0xff] %v1512_v0 }
  0x74   : > { %359 = vst [vmem:[#allocation2 + $0x8] sm:$0xff] %v1512_v0  ;;  %360 = vst [vmem:[#allocation2 + $0x48] sm:$0xff] %v1512_v0 }
  0x75   : > { %361 = vst [vmem:[#allocation2 + $0x40] sm:$0xff] %v1512_v0  ;;  %362 = vst [vmem:[#allocation2 + $0x20] sm:$0xff] %v1512_v0 }
  0x76   : > { %363 = vst [vmem:[#allocation2 + $0x10] sm:$0xff] %v1512_v0  ;;  %364 = vst [vmem:[#allocation2 + $0x38] sm:$0xff] %v1512_v0 }
  0x77   : > { %365 = vst [vmem:[#allocation2 + $0x60] sm:$0xff] %v1512_v0  ;;  %366 = vst [vmem:[#allocation2 + $0x70] sm:$0xff] %v1512_v0 }
  0x78   : > { %367 = vst [vmem:[#allocation2 + $0x78] sm:$0xff] %v1512_v0  ;;  %368 = vst [vmem:[#allocation2 + $0x28] sm:$0xff] %v1512_v0 }
  0x79 PF: > { %v1279_v1 = vld [vmem:[%s1767_s5 + $0x38] sm:$0xff]   ;;  %v1280_v2 = vld [vmem:[%s1767_s5 + $0x30] sm:$0xff]   ;;  %v1281_v3 = vld [vmem:[%s1767_s5 + $0x28] sm:$0xff]   ;;  %p1054_p1 = scmp.ne.s32.totalorder %s1487_s24, 1 }
  0x7a   : > { %1096 = vmatprep.subr.bf16.mxu0 %v1279_v1  ;;  %v1282_v4 = vld [vmem:[%s1767_s5 + $0x20] sm:$0xff]   ;;  %v1794_v6 = vld [vmem:[%s1759_s13 + $0x8] sm:$0xff]  ;;  %v1283_v8 = vld [vmem:[%s1767_s5 + $0x18] sm:$0xff]   ;;  %s2025_s1 = sld [smem:[#allocation24_spill]] (!%p1054_p1) }
  0x7b   : > { %1097 = vmatpush3.bf16.msra.mxu0 %v1279_v1  ;;  %v1791_v5 = vld [vmem:[%s1759_s13] sm:$0xff]  ;;  %v1287_v9 = vld [vmem:[%s1781_s9 + $0x38] sm:$0xff]   ;;  %v1288_v10 = vld [vmem:[%s1781_s9 + $0x30] sm:$0xff]  }
  0x7c   : > { %1098 = vmatprep.subr.bf16.mxu0 %v1280_v2  ;;  %v385_v7 = vpack.c.bf16 %v1794_v6, %v1791_v5  ;;  %v1284_v11 = vld [vmem:[%s1767_s5 + $0x10] sm:$0xff]   ;;  %1128 = vmatprep.subr.bf16.mxu1 %v1287_v9  ;;  %v1289_v12 = vld [vmem:[%s1781_s9 + $0x28] sm:$0xff]   ;;  %v1290_v14 = vld [vmem:[%s1781_s9 + $0x20] sm:$0xff]  }
  0x7d   : > { %1129 = vmatpush3.bf16.msra.mxu1 %v1287_v9  ;;  %v1285_v13 = vld [vmem:[%s1767_s5 + $0x8] sm:$0xff]   ;;  %v1286_v15 = vld [vmem:[%s1767_s5] sm:$0xff]   ;;  %v1291_v16 = vld [vmem:[%s1781_s9 + $0x18] sm:$0xff]  }
  0x7e   : > { %1112 = vmatprep.mubr.bf16.mxu0 %v385_v7  ;;  %1130 = vmatprep.subr.bf16.mxu1 %v1288_v10  ;;  %v1808_v17 = vld [vmem:[%s1759_s13 + $0x10] sm:$0xff]  ;;  %v1811_v18 = vld [vmem:[%s1759_s13 + $0x18] sm:$0xff]  ;;  %v1814_v19 = vld [vmem:[%s1759_s13 + $0x20] sm:$0xff] }
  0x7f   : > { %1099 = vmatpush3.bf16.msra.mxu0 %v1280_v2  ;;  %v1817_v20 = vld [vmem:[%s1759_s13 + $0x28] sm:$0xff]  ;;  %v386_v21 = vpack.c.bf16 %v1811_v18, %v1808_v17  ;;  %v1824_v23 = vld [vmem:[%s1759_s13 + $0x30] sm:$0xff]  ;;  %v1827_v24 = vld [vmem:[%s1759_s13 + $0x38] sm:$0xff] }
  0x80   : > { %1100 = vmatprep.subr.bf16.mxu0 %v1281_v3  ;;  %v387_v22 = vpack.c.bf16 %v1817_v20, %v1814_v19  ;;  %v1830_v25 = vld [vmem:[%s1759_s13 + $0x40] sm:$0xff]  ;;  %v1833_v26 = vld [vmem:[%s1759_s13 + $0x48] sm:$0xff]  ;;  %v388_v27 = vpack.c.bf16 %v1827_v24, %v1824_v23  ;;  %v1840_v29 = vld [vmem:[%s1759_s13 + $0x50] sm:$0xff] }
  0x81   : > { %1131 = vmatpush3.bf16.msra.mxu1 %v1288_v10  ;;  %v389_v28 = vpack.c.bf16 %v1833_v26, %v1830_v25  ;;  %v1843_v30 = vld [vmem:[%s1759_s13 + $0x58] sm:$0xff]  ;;  %v1846_v31 = vld [vmem:[%s1759_s13 + $0x60] sm:$0xff]  ;;  %v1849_v32 = vld [vmem:[%s1759_s13 + $0x68] sm:$0xff] }
  0x82   : > { %1132 = vmatprep.subr.bf16.mxu1 %v1289_v12  ;;  %v390_v33 = vpack.c.bf16 %v1843_v30, %v1840_v29  ;;  %v391_v34 = vpack.c.bf16 %v1849_v32, %v1846_v31  ;;  %v1856_v35 = vld [vmem:[%s1759_s13 + $0x70] sm:$0xff]  ;;  %v1859_v36 = vld [vmem:[%s1759_s13 + $0x78] sm:$0xff]  ;;  %v1293_v39 = vld [vmem:[%s1781_s9 + $0x8] sm:$0xff]  }
  0x83   : > { %1101 = vmatpush3.bf16.msra.mxu0 %v1281_v3  ;;  %v392_v37 = vpack.c.bf16 %v1859_v36, %v1856_v35  ;;  %v1292_v38 = vld [vmem:[%s1781_s9 + $0x10] sm:$0xff]   ;;  %v1294_v40 = vld [vmem:[%s1781_s9] sm:$0xff]  }
  0x84   : > { %1102 = vmatprep.subr.bf16.mxu0 %v1282_v4  ;;  %v1037_v43 = vld [vmem:[%s345_s8] ss:$0 sm:$0xff] }
  0x85   : > { %1133 = vmatpush3.bf16.msra.mxu1 %v1289_v12 }
  0x86   : > { %1134 = vmatprep.subr.bf16.mxu1 %v1290_v14 }
  0x87   : > { %1103 = vmatpush3.bf16.msra.mxu0 %v1282_v4 }
  0x88   : > { %1104 = vmatprep.subr.bf16.mxu0 %v1283_v8 }
  0x89   : > { %1135 = vmatpush3.bf16.msra.mxu1 %v1290_v14 }
  0x8a   : > { %1136 = vmatprep.subr.bf16.mxu1 %v1291_v16 }
  0x8b   : > { %1105 = vmatpush3.bf16.msra.mxu0 %v1283_v8 }
  0x8c   : > { %1106 = vmatprep.subr.bf16.mxu0 %v1284_v11 }
  0x8d   : > { %1137 = vmatpush3.bf16.msra.mxu1 %v1291_v16 }
  0x8e   : > { %1138 = vmatprep.subr.bf16.mxu1 %v1292_v38 }
  0x8f   : > { %1107 = vmatpush3.bf16.msra.mxu0 %v1284_v11 }
  0x90   : > { %1108 = vmatprep.subr.bf16.mxu0 %v1285_v13 }
  0x91   : > { %1139 = vmatpush3.bf16.msra.mxu1 %v1292_v38 }
  0x92   : > { %1140 = vmatprep.subr.bf16.mxu1 %v1293_v39 }
  0x93   : > { %1109 = vmatpush3.bf16.msra.mxu0 %v1285_v13 }
  0x94   : > { %1110 = vmatprep.subr.bf16.mxu0 %v1286_v15 }
  0x95   : > { %1141 = vmatpush3.bf16.msra.mxu1 %v1293_v39 }
  0x96   : > { %1142 = vmatprep.subr.bf16.mxu1 %v1294_v40 }
  0x97   : > { %1111 = vmatpush3.bf16.msra.mxu0 %v1286_v15 }
  0x99   : > { %1143 = vmatpush3.bf16.msra.mxu1 %v1294_v40 }
  0x9a   : > { %1113 = vmatmul.mubr.bf16.vlgmr.msra.gmra.mxu0 %v386_v21 }
  0x9b   : > { %1116 = vmatprep.mubr.bf16.mxu0 %v387_v22 }
  0xa2   : > { %1117 = vmatmul.mubr.bf16.gmra.mxu0 %v388_v27 }
  0xa3   : > { %1120 = vmatprep.mubr.bf16.mxu0 %v389_v28 }
  0xaa   : > { %1121 = vmatmul.mubr.bf16.gmra.mxu0 %v390_v33 }
  0xab   : > { %1124 = vmatprep.mubr.bf16.mxu0 %v391_v34 }
  0xb2   : > { %1125 = vmatmul.mubr.bf16.gmra.mxu0 %v392_v37 }
 0x15a   : > { %v1114_v41 = vpop.f32.mrf.mxu0 }
 0x15b   : > { %v507_v47 = vadd.f32 %v1114_v41, %v1037_v43 }
 0x15c   : > { %v498_v42 = vpop.f32.mrf.mxu0 }
 0x15d   : > { %v499_v45 = vadd.f32 %v1037_v43, %v498_v42  ;;  %v563_v54 = vmax.f32 %v507_v47, 0.0 }
 0x15e   : > { %v1115_v44 = vpop.f32.mrf.mxu0 }
 0x15f   : > { %v510_v46 = vadd.f32 %v1115_v44, %v1037_v43  ;;  %v561_v52 = vmax.f32 %v499_v45, 0.0 }
 0x160   : > { %v501_v48 = vpop.f32.mrf.mxu0 }
 0x161   : > { %v502_v49 = vadd.f32 %v1037_v43, %v501_v48  ;;  %v564_v50 = vmax.f32 %v510_v46, 0.0 }
 0x162   : > { %v1118_v51 = vpop.f32.mrf.mxu0 }
 0x163   : > { %v562_v53 = vmax.f32 %v502_v49, 0.0  ;;  %v594_v57 = vpack.c.bf16 %v564_v50, %v563_v54  ;;  %v523_v61 = vadd.f32 %v1118_v51, %v1037_v43  ;;  %v579_v51 = vld [vmem:[#allocation2 + $0x58] sm:$0xff] }
 0x164   : > { %v514_v55 = vpop.f32.mrf.mxu0 }
 0x165   : > { %v593_v56 = vpack.c.bf16 %v562_v53, %v561_v52  ;;  %v515_v59 = vadd.f32 %v1037_v43, %v514_v55  ;;  %v567_v4 = vmax.f32 %v523_v61, 0.0  ;;  %v577_v53 = vld [vmem:[#allocation2 + $0x30] sm:$0xff]  ;;  %v583_v61 = vld [vmem:[#allocation2 + $0x8] sm:$0xff] }
 0x166   : > { %v1119_v58 = vpop.f32.mrf.mxu0 }
 0x167   : > { %v526_v60 = vadd.f32 %v1119_v58, %v1037_v43  ;;  %1144 = vmatprep.mubr.bf16.mxu1 %v593_v56  ;;  %v565_v2 = vmax.f32 %v515_v59, 0.0  ;;  %v580_v56 = vld [vmem:[#allocation2 + $0x18] sm:$0xff]  ;;  %v578_v59 = vld [vmem:[#allocation2] sm:$0xff] }
 0x168   : > { %v517_v62 = vpop.f32.mrf.mxu0  ;;  %1145 = vmatmul.mubr.bf16.vlgmr.msra.gmra.mxu1 %v594_v57 }
 0x169   : > { %v518_v63 = vadd.f32 %v1037_v43, %v517_v62  ;;  %v568_v0 = vmax.f32 %v526_v60, 0.0 }
 0x16a   : > { %v1122_v1 = vpop.f32.mrf.mxu0 }
 0x16b   : > { %v566_v3 = vmax.f32 %v518_v63, 0.0  ;;  %v596_v9 = vpack.c.bf16 %v568_v0, %v567_v4  ;;  %v539_v13 = vadd.f32 %v1122_v1, %v1037_v43  ;;  %v581_v0 = vld [vmem:[#allocation2 + $0x50] sm:$0xff] }
 0x16c   : > { %v530_v7 = vpop.f32.mrf.mxu0 }
 0x16d   : > { %v595_v8 = vpack.c.bf16 %v566_v3, %v565_v2  ;;  %v531_v11 = vadd.f32 %v1037_v43, %v530_v7  ;;  %v571_v28 = vmax.f32 %v539_v13, 0.0  ;;  %v584_v3 = vld [vmem:[#allocation2 + $0x48] sm:$0xff] }
 0x16e   : > { %v1123_v10 = vpop.f32.mrf.mxu0 }
 0x16f   : > { %v542_v12 = vadd.f32 %v1123_v10, %v1037_v43  ;;  %1148 = vmatprep.mubr.bf16.mxu1 %v595_v8  ;;  %v569_v22 = vmax.f32 %v531_v11, 0.0  ;;  %v582_v8 = vld [vmem:[#allocation2 + $0x68] sm:$0xff]  ;;  %v587_v11 = vld [vmem:[#allocation2 + $0x10] sm:$0xff] }
 0x170   : > { %v533_v14 = vpop.f32.mrf.mxu0  ;;  %1149 = vmatmul.mubr.bf16.gmra.mxu1 %v596_v9 }
 0x171   : > { %v534_v15 = vadd.f32 %v1037_v43, %v533_v14  ;;  %v572_v16 = vmax.f32 %v542_v12, 0.0  ;;  %v585_v14 = vld [vmem:[#allocation2 + $0x40] sm:$0xff] }
 0x172   : > { %v1126_v21 = vpop.f32.mrf.mxu0 }
 0x173   : > { %v570_v27 = vmax.f32 %v534_v15, 0.0  ;;  %v598_v37 = vpack.c.bf16 %v572_v16, %v571_v28  ;;  %v555_v41 = vadd.f32 %v1126_v21, %v1037_v43  ;;  %v588_v21 = vld [vmem:[#allocation2 + $0x38] sm:$0xff]  ;;  %v586_v28 = vld [vmem:[#allocation2 + $0x20] sm:$0xff] }
 0x174   : > { %v546_v33 = vpop.f32.mrf.mxu0 }
 0x175   : > { %v597_v34 = vpack.c.bf16 %v570_v27, %v569_v22  ;;  %v547_v39 = vadd.f32 %v1037_v43, %v546_v33  ;;  %v575_v48 = vmax.f32 %v555_v41, 0.0 }
 0x176   : > { %v1127_v38 = vpop.f32.mrf.mxu0 }
 0x177   : > { %v558_v40 = vadd.f32 %v1127_v38, %v1037_v43  ;;  %1152 = vmatprep.mubr.bf16.mxu1 %v597_v34  ;;  %v573_v46 = vmax.f32 %v547_v39, 0.0 }
 0x178   : > { %v549_v42 = vpop.f32.mrf.mxu0  ;;  %1153 = vmatmul.mubr.bf16.gmra.mxu1 %v598_v37  ;;  %v591_v37 = vld [vmem:[#allocation2 + $0x78] sm:$0xff] }
 0x179   : > { %v550_v44 = vadd.f32 %v1037_v43, %v549_v42  ;;  %v576_v45 = vmax.f32 %v558_v40, 0.0  ;;  %v589_v40 = vld [vmem:[#allocation2 + $0x60] sm:$0xff] }
 0x17b   : > { %v574_v47 = vmax.f32 %v550_v44, 0.0  ;;  %v600_v50 = vpack.c.bf16 %v576_v45, %v575_v48  ;;  %v592_v44 = vld [vmem:[#allocation2 + $0x28] sm:$0xff] }
 0x17d   : > { %v599_v49 = vpack.c.bf16 %v574_v47, %v573_v46  ;;  %v590_v47 = vld [vmem:[#allocation2 + $0x70] sm:$0xff] }
 0x17f   : > { %1156 = vmatprep.mubr.bf16.mxu1 %v599_v49 }
 0x180   : > { %1157 = vmatmul.mubr.bf16.gmra.mxu1 %v600_v50 }
 0x228   : > { %v1146_v52 = vpop.f32.mrf.mxu1 }
 0x229   : > { %v764_v54 = vadd.f32 %v1146_v52, %v579_v51 }
 0x22a   : > { %v699_v55 = vpop.f32.mrf.mxu1 }
 0x22b   : > { %780 = vst [vmem:[#allocation2 + $0x58] sm:$0xff] %v764_v54  ;;  %v762_v57 = vadd.f32 %v699_v55, %v577_v53 }
 0x22c   : > { %v1147_v58 = vpop.f32.mrf.mxu1 }
 0x22d   : > { %778 = vst [vmem:[#allocation2 + $0x30] sm:$0xff] %v762_v57  ;;  %v765_v43 = vadd.f32 %v1147_v58, %v580_v56 }
 0x22e   : > { %v702_v60 = vpop.f32.mrf.mxu1 }
 0x22f   : > { %781 = vst [vmem:[#allocation2 + $0x18] sm:$0xff] %v765_v43  ;;  %v763_v62 = vadd.f32 %v702_v60, %v578_v59 }
 0x230   : > { %v1150_v63 = vpop.f32.mrf.mxu1 }
 0x231   : > { %779 = vst [vmem:[#allocation2] sm:$0xff] %v763_v62  ;;  %v768_v1 = vadd.f32 %v1150_v63, %v583_v61 }
 0x232   : > { %v715_v2 = vpop.f32.mrf.mxu1 }
 0x233   : > { %784 = vst [vmem:[#allocation2 + $0x8] sm:$0xff] %v768_v1  ;;  %v766_v4 = vadd.f32 %v715_v2, %v581_v0 }
 0x234   : > { %v1151_v7 = vpop.f32.mrf.mxu1 }
 0x235   : > { %782 = vst [vmem:[#allocation2 + $0x50] sm:$0xff] %v766_v4  ;;  %v769_v9 = vadd.f32 %v1151_v7, %v584_v3 }
 0x236   : > { %v718_v10 = vpop.f32.mrf.mxu1 }
 0x237   : > { %785 = vst [vmem:[#allocation2 + $0x48] sm:$0xff] %v769_v9  ;;  %v767_v12 = vadd.f32 %v718_v10, %v582_v8 }
 0x238   : > { %v1154_v13 = vpop.f32.mrf.mxu1 }
 0x239   : > { %783 = vst [vmem:[#allocation2 + $0x68] sm:$0xff] %v767_v12  ;;  %v772_v15 = vadd.f32 %v1154_v13, %v587_v11 }
 0x23a   : > { %v731_v16 = vpop.f32.mrf.mxu1 }
 0x23b   : > { %788 = vst [vmem:[#allocation2 + $0x10] sm:$0xff] %v772_v15  ;;  %v770_v22 = vadd.f32 %v731_v16, %v585_v14 }
 0x23c   : > { %v1155_v27 = vpop.f32.mrf.mxu1 }
 0x23d   : > { %786 = vst [vmem:[#allocation2 + $0x40] sm:$0xff] %v770_v22  ;;  %v773_v33 = vadd.f32 %v1155_v27, %v588_v21 }
 0x23e   : > { %v734_v34 = vpop.f32.mrf.mxu1 }
 0x23f   : > { %789 = vst [vmem:[#allocation2 + $0x38] sm:$0xff] %v773_v33  ;;  %v771_v38 = vadd.f32 %v734_v34, %v586_v28 }
 0x240   : > { %v1158_v39 = vpop.f32.mrf.mxu1 }
 0x241   : > { %787 = vst [vmem:[#allocation2 + $0x20] sm:$0xff] %v771_v38  ;;  %v776_v41 = vadd.f32 %v1158_v39, %v591_v37 }
 0x242   : > { %v747_v42 = vpop.f32.mrf.mxu1 }
 0x243   : > { %792 = vst [vmem:[#allocation2 + $0x78] sm:$0xff] %v776_v41  ;;  %v774_v45 = vadd.f32 %v747_v42, %v589_v40 }
 0x244   : > { %v1159_v46 = vpop.f32.mrf.mxu1 }
 0x245   : > { %790 = vst [vmem:[#allocation2 + $0x60] sm:$0xff] %v774_v45  ;;  %v777_v48 = vadd.f32 %v1159_v46, %v592_v44  ;;  %797 = sbr.rel (%p1054_p1) target bundleno = 600 (0x258), region = 60 }
 0x246   : > { %v750_v49 = vpop.f32.mrf.mxu1 }
 0x247   : > { %793 = vst [vmem:[#allocation2 + $0x28] sm:$0xff] %v777_v48  ;;  %v775_v50 = vadd.f32 %v750_v49, %v590_v47 }
 0x249   : > { %791 = vst [vmem:[#allocation2 + $0x70] sm:$0xff] %v775_v50 }
 0x24a   : > { %v798_v51 = vld [vmem:[#allocation2 + $0x30] sm:$0xff]  ;;  %v1055_v52 = vld [vmem:[%s2025_s1] ss:$0 sm:$0xff]  ;;  %v800_v56 = vld [vmem:[#allocation2 + $0x58] sm:$0xff] }
 0x24b   : > { %v799_v53 = vld [vmem:[#allocation2] sm:$0xff]  ;;  %v821_v54 = vadd.f32 %v1055_v52, %v798_v51  ;;  %v801_v57 = vld [vmem:[#allocation2 + $0x18] sm:$0xff]  ;;  %v802_v58 = vld [vmem:[#allocation2 + $0x50] sm:$0xff]  ;;  %v823_v59 = vadd.f32 %v1055_v52, %v800_v56 }
 0x24c   : > { %v822_v55 = vadd.f32 %v1055_v52, %v799_v53  ;;  %v824_v43 = vadd.f32 %v1055_v52, %v801_v57  ;;  %v825_v60 = vadd.f32 %v1055_v52, %v802_v58  ;;  %v803_v61 = vld [vmem:[#allocation2 + $0x68] sm:$0xff]  ;;  %v806_v4 = vld [vmem:[#allocation2 + $0x40] sm:$0xff]  ;;  %v808_v8 = vld [vmem:[#allocation2 + $0x10] sm:$0xff] }
 0x24d   : > { %v804_v62 = vld [vmem:[#allocation2 + $0x8] sm:$0xff]  ;;  %v837_v0 = vadd.f32 %v821_v54, %v1791_v5  ;;  %v826_v2 = vadd.f32 %v1055_v52, %v803_v61  ;;  %v807_v7 = vld [vmem:[#allocation2 + $0x20] sm:$0xff]  ;;  %v839_v9 = vadd.f32 %v823_v59, %v1808_v17  ;;  %v809_v13 = vld [vmem:[#allocation2 + $0x38] sm:$0xff]  ;;  %v829_v16 = vadd.f32 %v1055_v52, %v806_v4 }
 0x24e   : > { %v805_v63 = vld [vmem:[#allocation2 + $0x48] sm:$0xff]  ;;  %v838_v1 = vadd.f32 %v822_v55, %v1794_v6  ;;  %v827_v3 = vadd.f32 %v1055_v52, %v804_v62  ;;  %v840_v10 = vadd.f32 %v824_v43, %v1811_v18  ;;  %v841_v11 = vadd.f32 %v825_v60, %v1814_v19  ;;  %v810_v14 = vld [vmem:[#allocation2 + $0x60] sm:$0xff]  ;;  %v812_v21 = vld [vmem:[#allocation2 + $0x78] sm:$0xff] }
 0x24f   : > { %v828_v12 = vadd.f32 %v1055_v52, %v805_v63  ;;  %853 = vst [vmem:[%s1783_s11] sm:$0xff] %v837_v0  ;;  %v842_v6 = vadd.f32 %v826_v2, %v1817_v20  ;;  %v830_v17 = vadd.f32 %v1055_v52, %v807_v7  ;;  %v813_v18 = vld [vmem:[#allocation2 + $0x28] sm:$0xff]  ;;  %855 = vst [vmem:[%s1783_s11 + $0x10] sm:$0xff] %v839_v9 }
 0x250   : > { %v811_v5 = vld [vmem:[#allocation2 + $0x70] sm:$0xff]  ;;  %854 = vst [vmem:[%s1783_s11 + $0x8] sm:$0xff] %v838_v1  ;;  %v843_v15 = vadd.f32 %v827_v3, %v1824_v23  ;;  %856 = vst [vmem:[%s1783_s11 + $0x18] sm:$0xff] %v840_v10  ;;  %v831_v22 = vadd.f32 %v1055_v52, %v808_v8  ;;  %v832_v27 = vadd.f32 %v1055_v52, %v809_v13 }
 0x251   : > { %857 = vst [vmem:[%s1783_s11 + $0x20] sm:$0xff] %v841_v11  ;;  %v844_v19 = vadd.f32 %v828_v12, %v1827_v24  ;;  %v833_v28 = vadd.f32 %v1055_v52, %v810_v14  ;;  %858 = vst [vmem:[%s1783_s11 + $0x28] sm:$0xff] %v842_v6  ;;  %v845_v20 = vadd.f32 %v829_v16, %v1830_v25 }
 0x252   : > { %859 = vst [vmem:[%s1783_s11 + $0x30] sm:$0xff] %v843_v15  ;;  %v846_v23 = vadd.f32 %v830_v17, %v1833_v26  ;;  %v834_v33 = vadd.f32 %v1055_v52, %v811_v5  ;;  %v835_v34 = vadd.f32 %v1055_v52, %v812_v21  ;;  %v847_v24 = vadd.f32 %v831_v22, %v1840_v29 }
 0x253   : > { %860 = vst [vmem:[%s1783_s11 + $0x38] sm:$0xff] %v844_v19  ;;  %v848_v37 = vadd.f32 %v832_v27, %v1843_v30  ;;  %v849_v38 = vadd.f32 %v833_v28, %v1846_v31  ;;  %v836_v39 = vadd.f32 %v1055_v52, %v813_v18  ;;  %861 = vst [vmem:[%s1783_s11 + $0x40] sm:$0xff] %v845_v20 }
 0x254   : > { %862 = vst [vmem:[%s1783_s11 + $0x48] sm:$0xff] %v846_v23  ;;  %v850_v40 = vadd.f32 %v834_v33, %v1849_v32  ;;  %v851_v25 = vadd.f32 %v835_v34, %v1856_v35  ;;  %863 = vst [vmem:[%s1783_s11 + $0x50] sm:$0xff] %v847_v24 }
 0x255   : > { %864 = vst [vmem:[%s1783_s11 + $0x58] sm:$0xff] %v848_v37  ;;  %865 = vst [vmem:[%s1783_s11 + $0x60] sm:$0xff] %v849_v38  ;;  %v852_v26 = vadd.f32 %v836_v39, %v1859_v36 }
 0x256   : > { %866 = vst [vmem:[%s1783_s11 + $0x68] sm:$0xff] %v850_v40  ;;  %867 = vst [vmem:[%s1783_s11 + $0x70] sm:$0xff] %v851_v25 }
 0x257   : > { %868 = vst [vmem:[%s1783_s11 + $0x78] sm:$0xff] %v852_v26 }
 0x258 PF: > { %s2026_s24 = sld [smem:[#allocation15_spill]]  ;;  %s883_s6 = sshll.u32 %s1783_s11, 4  ;;  %s1914_s6 = int_to_ptr.vmem [resolvable:$true] %s883_s6 }
 0x259   : > { %s2028_s13 = sld [smem:[#allocation25_spill]]  ;;  %s870_s17 = scalar_lea.sflag [#allocation5], %s1755_s7 }
 0x25a   : > { %s1379_s25 = scalar_lea.vmem %s1914_s6, 2048  ;;  %s1513_s5 = smov [#allocation9]  }
 0x25b   : > { %p1380_p10 = scmp.ne.s32.totalorder %s1914_s6, %s1379_s25  ;;  %s1383_s14 = sshll.u32 %s1513_s5, 4  ;;  %s1384_s14 = int_to_ptr.vmem [resolvable:$false] %s1383_s14 }
 0x25c   : > { %s1385_s30 = scalar_lea.vmem %s1384_s14, 4096  ;;  %p1386_p8 = scmp.lt.s32.totalorder %s1914_s6, %s1384_s14 }
 0x25d   : > { %p1381_p3 = pnand %p1380_p10, %p1705_p0  ;;  %p1387_p9 = scmp.lt.s32.totalorder %s1385_s30, %s1379_s25 }
 0x25e   : > { %s1063_s0 = sshll.u32 %s2026_s24, 11 }
 0x25f   : > { %s1911_s29 = scalar_lea.hbm %s2028_s13, %s1063_s0  ;;  %p1382_p5 = pneg %p1381_p3 }
 0x260   : > { %p1388_p13 = por %p1387_p9, %p1386_p8 }
 0x262   : > { %p1389_p2 = pnand %p1388_p13, %p1382_p5 }
 0x264   : > { %1392 = shalt.err (!%p1389_p2)
}
 0x265   : > { %s1393_s18 = scalar_lea.hbm %s1911_s29, 2048  ;;  %s1397_s11 = scalar_lea.hbm %s2028_s13, 4096 }
 0x266   : > { %p1394_p12 = scmp.ne.s32.totalorder %s1911_s29, %s1393_s18  ;;  %p1398_p7 = scmp.lt.s32.totalorder %s1911_s29, %s2028_s13 }
 0x267   : > { %p1399_p11 = scmp.lt.s32.totalorder %s1397_s11, %s1393_s18 }
 0x268   : > { %p1395_p6 = pnand %p1394_p12, %p1705_p0 }
 0x269   : > { %p1400_p1 = por %p1399_p11, %p1398_p7 }
 0x26a   : > { %p1396_p4 = pneg %p1395_p6 }
 0x26c   : > { %p1401_p10 = pnand %p1400_p1, %p1396_p4 }
 0x26e   : > { %1404 = shalt.err (!%p1401_p10)
}
 0x26f   : > { %s1514_s27 = smov 128   ;;  %s1515_s15 = smov 8  }
 0x270   : > { %1166 = dma.vmem_to_hbm [thread:$0]  (%p1705_p0), %s1914_s6, 2048, %s1911_s29, %s870_s17, %s1514_s27, %s1514_s27, %s1515_s15  }
 0x271 PF: > { %p1183_p3 = scmp.ge.s32.totalorder %s1503_s28, 2  ;;  %s898_s1 = sand.u32 1, %s1475_s21  }
 0x272   : > { %p2029_p5 = scmp.ne.s32.totalorder %s2017_s20, 0  ;;  %s899_s24 = scalar_lea.sflag [#allocation5], %s898_s1 }
 0x274   : > { %p1179_p8 = pnand %p1183_p3, %p2029_p5 }
 0x276   : > { %p1180_p9 = pneg %p1179_p8 }
 0x278   : > { %1458 = dma.done.wait (%p1180_p9), %s899_s24, 2048  }
 0x279   : > { %1460 = vsyncadd (%p1180_p9), %s899_s24, 4294965248  ;;  %s24_s28 = sadd.s32 1, %s1503_s28   ;;  %s2030_s0 = sld [smem:[#allocation13_spill]] }
 0x27a   : > { %p21_p13 = scmp.ge.s32.totalorder %s24_s28, 6   ;;  %s2031_s20 = sld [smem:[#allocation18_spill]] }
 0x27b   : > { %s2032_s7 = sld [smem:[#allocation14_spill]]  ;;  %s2037_s18 = smov %s1467_s19 }
 0x27c   : > { %s2033_s23 = sld [smem:[#allocation21_spill]]  ;;  %s2039_s21 = smov %s1479_s22 }
 0x27d   : > { %s2034_s25 = sld [smem:[#allocation16_spill]]  ;;  %s2041_s24 = smov %s1495_s26 }
 0x27e   : > { %s2035_s12 = sld [smem:[#allocation17_spill]] }
 0x27f   : > { %s2036_s27 = sld [smem:[#allocation19_spill]]  ;;  %s2038_s19 = smov %s2030_s0 }
 0x280   :  { %23 = sbr.rel (!%p21_p13) target bundleno = 16 (0x10), region = 120 }
 0x281   : > { %s2040_s22 = smov %s2032_s7 }
 0x284   : > { %s2042_s26 = smov %s2035_s12 }
 0x285   :  { %904 = vsyncpa [#allocation4], 1 }
 0x286   :  { %906 = vsyncpa [#allocation4 + $0x1], 1 }
 0x287   :  { %907 = vsyncpa [#allocation7], 1 }
 0x288   :  { %909 = vsyncpa [#allocation7 + $0x1], 1 }
 0x289   :  { %910 = vsyncpa [#allocation5], 1 }
 0x28a   :  { %912 = vsyncpa [#allocation5 + $0x1], 1 }

</bundles_post_ra>
